<compile_context>
chip_gen: v6e
topology: v6e:2x2x1
jax: 0.10.0
libtpu: 0.0.40
codegen_flags: <defaults>
</compile_context>

<pallas_src>
import functools
import math

import jax
import jax.numpy as jnp
from jax.experimental import pallas as pl
from jax.experimental.pallas import tpu as pltpu


# ----------------------------- fused Pallas kernel -----------------------------

def _gnn_fused_kernel(a_ref, x_ref, wg_ref, wqt_ref, bqt_ref, wkv_ref, wo_ref, vec_ref,
                      o_ref, *, heads):
    f32 = jnp.float32
    n = a_ref.shape[0]                 # number of nodes (L)
    d_model = wg_ref.shape[1]          # channels after the GCN block (D)
    rb = n // heads                    # node rows per head
    s = d_model // n                   # column groups of size n inside D
    trans_b = (((1,), (1,)), ((), ()))

    # ---- GCNConv (add_self_loops=False, bias=False): h = A_hat @ (X @ W) ----
    xw = jnp.dot(x_ref[...], wg_ref[...], preferred_element_type=f32)
    h = jnp.dot(a_ref[...], xw, preferred_element_type=f32)
    # GNNBlock residual branch ('normal'): x = relu(x) + x
    h = jnp.maximum(h, 0.0) + h

    # ---- LayerNorm 1 ----
    g1 = vec_ref[0:1, 0:d_model]
    b1 = vec_ref[1:2, 0:d_model]
    mu = jnp.mean(h, axis=-1, keepdims=True)
    var = jnp.mean((h - mu) ** 2, axis=-1, keepdims=True)
    y = (h - mu) * jax.lax.rsqrt(var + 1e-5) * g1 + b1

    # ---- projections (1/sqrt(d_model) already folded into Wq/Wk/bq/bk on the host) ----
    # q is produced directly in (channel, node) orientation with its output channels
    # pre-permuted on the host so the per-head score rows come out in exactly the order
    # the final out-projection needs (no in-kernel layout matmuls).
    qT = jax.lax.dot_general(wqt_ref[...], y, trans_b,
                             preferred_element_type=f32) + bqt_ref[...]      # (D, n)
    kv = jnp.dot(y, wkv_ref[...], preferred_element_type=f32) + vec_ref[2:3, :]
    k = kv[:, 0:d_model]                                                      # (n, D)
    v = kv[:, d_model:2 * d_model]                                            # (n, D)

    # ---- multi-head self attention reproducing the module's raw `.view(B*H, d, L)`
    # reinterpretation.  Head hh only reads q/k/v node rows [hh*rb, (hh+1)*rb); the view
    # scrambling is absorbed by the host-side Wq column / Wo row permutations, so the
    # in-kernel regroup is plain static slices and concatenation.
    head_blocks = []
    for hh in range(heads):
        r0 = hh * rb
        scores = jnp.zeros((n, n), f32)
        for e in range(s):
            qblk = qT[e * n:(e + 1) * n, r0:r0 + rb]          # (n, rb)
            kblk = k[r0:r0 + rb, e * n:(e + 1) * n]           # (rb, n)
            scores = scores + jnp.dot(qblk, kblk, preferred_element_type=f32)
        scores = scores - jnp.max(scores, axis=-1, keepdims=True)
        p = jnp.exp(scores)
        denom = jnp.sum(p, axis=-1, keepdims=True)            # in [1, n]
        r = pl.reciprocal(denom, approx=True)                 # EUP slot
        r = r * (2.0 - denom * r)                             # one Newton step (1e-4 parity)
        p = p * r
        pieces = []
        for e in range(s):
            vblk = v[r0:r0 + rb, e * n:(e + 1) * n]           # (rb, n)
            m_he = jax.lax.dot_general(p, vblk, trans_b,
                                       preferred_element_type=f32)           # (n, rb)
            for w in range(heads):
                pieces.append(m_he[w * rb:(w + 1) * rb, :])   # (rb, rb)
        head_blocks.append(jnp.concatenate(pieces, axis=1))   # (rb, D), cols (e, w, u)
    a_perm = jnp.concatenate(head_blocks, axis=0)             # (n, D)

    # ---- out_proj (Wo rows pre-permuted to match a_perm's column order) + LayerNorm 2 ----
    out = (jnp.dot(a_perm, wo_ref[...], preferred_element_type=f32)
           + vec_ref[3:4, 0:d_model])
    g2 = vec_ref[4:5, 0:d_model]
    b2 = vec_ref[5:6, 0:d_model]
    mu2 = jnp.mean(out, axis=-1, keepdims=True)
    var2 = jnp.mean((out - mu2) ** 2, axis=-1, keepdims=True)
    o_ref[...] = (out - mu2) * jax.lax.rsqrt(var2 + 1e-5) * g2 + b2


# ----------------------------- host-side helpers -----------------------------

def gcn_norm_adj(edge_index, num_nodes):
    # Dense normalized adjacency (GCNConv, add_self_loops=False, edge_weight=1).
    row, col = edge_index[0], edge_index[1]          # row = source, col = target
    ones = jnp.ones(row.shape[0], dtype=jnp.float32)
    deg = jnp.zeros((num_nodes,), jnp.float32).at[col].add(ones)
    dinv = jnp.where(deg > 0, 1.0 / jnp.sqrt(deg), 0.0)
    norm = dinv[row] * dinv[col]
    a = jnp.zeros((num_nodes, num_nodes), jnp.float32).at[col, row].add(norm)
    return a


def prepare_inputs(params, edge_index, num_nodes, num_heads):
    """One-time host-side prep (depends only on params/edge_index, not on x):
    normalized adjacency, merged + permuted weights, packed small-vector slab."""
    n = num_nodes
    d_model = params["w_gcn"].shape[1]
    # The fused kernel folds torch's raw .view reinterpretations into weight
    # permutations; that decomposition needs these divisibilities.
    # TODO(synk): general (d_model % n != 0) shapes would need an in-kernel reshape path.
    assert d_model % num_heads == 0 and d_model % n == 0 and n % num_heads == 0
    rb = n // num_heads
    s = d_model // n
    d = d_model // num_heads
    scale = 1.0 / math.sqrt(d_model)

    # sigma: permuted score-row index l~ = w*rb + u2  ->  original row l = u2*H + w
    l_t = jnp.arange(n)
    sigma = (l_t % rb) * num_heads + (l_t // rb)
    # Column permutation of Wq (applied within each group of n columns).
    j = jnp.arange(d_model)
    perm_q = (j // n) * n + sigma[j % n]
    wqt = (params["wq"] * scale)[:, perm_q].T                       # (D, D), row = out chan
    bqt = (params["bq"][0] * scale)[perm_q].reshape(d_model, 1)     # (D, 1)

    # Row permutation of Wo matching a_perm's (e, w, u) column ordering:
    # column j = e*n + w*rb + u of a_perm holds a_reshaped column w*d + u*s + e.
    e_i = j // n
    w_i = (j % n) // rb
    u_i = j % rb
    perm_o = w_i * d + u_i * s + e_i
    wo_perm = params["wo"][perm_o, :]                               # (D, D)

    wkv = jnp.concatenate([params["wk"] * scale, params["wv"]], axis=1)    # (D, 2D)

    def pad_row(vrow):
        return jnp.concatenate([vrow, jnp.zeros((1, d_model), jnp.float32)], axis=1)

    vecs = jnp.concatenate([
        pad_row(params["ln1_g"]), pad_row(params["ln1_b"]),
        jnp.concatenate([params["bk"] * scale, params["bv"]], axis=1),
        pad_row(params["bo"]), pad_row(params["ln2_g"]), pad_row(params["ln2_b"]),
    ], axis=0)                                                      # (6, 2D)

    return {
        "a_hat": gcn_norm_adj(edge_index, n),
        "w_gcn": params["w_gcn"],
        "wqt": wqt, "bqt": bqt, "wkv": wkv, "wo_perm": wo_perm, "vecs": vecs,
    }


def gnn_forward(x, prep, num_heads):
    n = x.shape[0]
    d_model = prep["w_gcn"].shape[1]
    kernel = functools.partial(_gnn_fused_kernel, heads=num_heads)
    vmem = pltpu.MemorySpace.VMEM
    out = pl.pallas_call(
        kernel,
        out_shape=jax.ShapeDtypeStruct((n, d_model), jnp.float32),
        in_specs=[pl.BlockSpec(memory_space=vmem)] * 8,
        out_specs=pl.BlockSpec(memory_space=vmem),
    )(prep["a_hat"], x, prep["w_gcn"], prep["wqt"], prep["bqt"],
      prep["wkv"], prep["wo_perm"], prep["vecs"])
    # classifier == False -> return node features directly (as (1, N, D) like the module)
    # TODO(synk): classifier=True branch (MeanAggregation over batch + fc stack) not exercised.
    return out.reshape(1, n, d_model)


# ----------------------------- pure-JAX reference -----------------------------

def _ln_ref(x, g, b):
    mu = jnp.mean(x, axis=-1, keepdims=True)
    var = jnp.mean((x - mu) ** 2, axis=-1, keepdims=True)
    return (x - mu) * jax.lax.rsqrt(var + 1e-5) * g + b


def reference_forward(x, edge_index, p, num_heads):
    n = x.shape[0]
    a_hat = gcn_norm_adj(edge_index, n)
    h = a_hat @ (x @ p["w_gcn"])
    h = jnp.maximum(h, 0.0) + h
    h = _ln_ref(h, p["ln1_g"], p["ln1_b"])
    d_model = h.shape[1]
    scale = 1.0 / math.sqrt(d_model)
    q = h @ p["wq"] + p["bq"]
    k = h @ p["wk"] + p["bk"]
    v = h @ p["wv"] + p["bv"]
    d = d_model // num_heads
    # torch: (Q*scale).view(B*H, d, L).transpose(1, 2) -- raw row-major reinterpretation
    qh = jnp.transpose((q * scale).reshape(num_heads, d, n), (0, 2, 1))
    kh = (k * scale).reshape(num_heads, d, n)
    vh = jnp.transpose(v.reshape(num_heads, d, n), (0, 2, 1))
    s = jnp.einsum("hnd,hdm->hnm", qh, kh)
    w = jax.nn.softmax(s, axis=-1)
    a = jnp.einsum("hnm,hmd->hnd", w, vh).reshape(n, d_model)
    out = a @ p["wo"] + p["bo"]
    out = _ln_ref(out, p["ln2_g"], p["ln2_b"])
    return out.reshape(1, n, d_model)


# ----------------------------- main -----------------------------

if __name__ == "__main__":
    N, C_IN, C_OUT, HEADS = 16, 8, 32, 4

    key = jax.random.PRNGKey(0)
    ks = jax.random.split(key, 10)

    x = jax.random.normal(ks[0], (N, C_IN), dtype=jnp.float32)

    # deterministic graph: bidirectional ring over N nodes
    src = jnp.arange(N, dtype=jnp.int32)
    dst = (src + 1) % N
    edge_index = jnp.stack(
        [jnp.concatenate([src, dst]), jnp.concatenate([dst, src])], axis=0
    )

    def init_w(k, fan_in, shape):
        return jax.random.normal(k, shape, dtype=jnp.float32) / math.sqrt(fan_in)

    params = {
        "w_gcn": init_w(ks[1], C_IN, (C_IN, C_OUT)),             # GCNConv weight (in, out)
        "ln1_g": jnp.ones((1, C_OUT), jnp.float32),
        "ln1_b": jnp.zeros((1, C_OUT), jnp.float32),
        "wq": init_w(ks[2], C_OUT, (C_OUT, C_OUT)),              # stored as (in, out)
        "bq": init_w(ks[3], C_OUT, (1, C_OUT)),
        "wk": init_w(ks[4], C_OUT, (C_OUT, C_OUT)),
        "bk": init_w(ks[5], C_OUT, (1, C_OUT)),
        "wv": init_w(ks[6], C_OUT, (C_OUT, C_OUT)),
        "bv": init_w(ks[7], C_OUT, (1, C_OUT)),
        "wo": init_w(ks[8], C_OUT, (C_OUT, C_OUT)),
        "bo": init_w(ks[9], C_OUT, (1, C_OUT)),
        "ln2_g": jnp.ones((1, C_OUT), jnp.float32),
        "ln2_b": jnp.zeros((1, C_OUT), jnp.float32),
    }

    # One-time prep (adjacency normalization, weight merging/permutation, vector packing)
    prep = jax.tree_util.tree_map(jax.block_until_ready,
                                  prepare_inputs(params, edge_index, N, HEADS))

    fwd = jax.jit(gnn_forward, static_argnames=("num_heads",))
    out = fwd(x, prep, num_heads=HEADS)
    out = jax.block_until_ready(out)

    ref = reference_forward(x, edge_index, params, HEADS)
    assert out.shape == (1, N, C_OUT), out.shape
    assert jnp.allclose(out, ref, rtol=1e-4, atol=1e-4), float(jnp.max(jnp.abs(out - ref)))

    print("KERNEL_OK")
</pallas_src>

<mosaic_0001>
module attributes {stable_mosaic.version = 11 : i64} {
  func.func @_gnn_fused_kernel(%arg0: memref<16x16xf32, #tpu.memory_space<vmem>>, %arg1: memref<16x8xf32, #tpu.memory_space<vmem>>, %arg2: memref<8x32xf32, #tpu.memory_space<vmem>>, %arg3: memref<32x32xf32, #tpu.memory_space<vmem>>, %arg4: memref<32x1xf32, #tpu.memory_space<vmem>>, %arg5: memref<32x64xf32, #tpu.memory_space<vmem>>, %arg6: memref<32x32xf32, #tpu.memory_space<vmem>>, %arg7: memref<6x64xf32, #tpu.memory_space<vmem>>, %arg8: memref<16x32xf32, #tpu.memory_space<vmem>>) attributes {dimension_semantics = [], scalar_prefetch = 0 : i64, scratch_operands = 0 : i64, tpu.core_type = #tpu.core_type<tc>} {
    %c0 = arith.constant 0 : index
    %c0_0 = arith.constant 0 : index
    %0 = vector.load %arg1[%c0, %c0_0] : memref<16x8xf32, #tpu.memory_space<vmem>>, vector<16x8xf32>
    %c0_1 = arith.constant 0 : index
    %c0_2 = arith.constant 0 : index
    %1 = vector.load %arg2[%c0_1, %c0_2] : memref<8x32xf32, #tpu.memory_space<vmem>>, vector<8x32xf32>
    %cst = arith.constant dense<0.000000e+00> : vector<16x32xf32>
    %2 = tpu.matmul %0, %1, %cst {dimension_numbers = #tpu.dot_dimension_numbers<[1], [0], [0], [1], [0, 0, 1, 1], [], []>} : vector<16x8xf32>, vector<8x32xf32>, vector<16x32xf32> -> vector<16x32xf32>
    %c0_3 = arith.constant 0 : index
    %c0_4 = arith.constant 0 : index
    %3 = vector.load %arg0[%c0_3, %c0_4] : memref<16x16xf32, #tpu.memory_space<vmem>>, vector<16x16xf32>
    %cst_5 = arith.constant dense<0.000000e+00> : vector<16x32xf32>
    %4 = tpu.matmul %3, %2, %cst_5 {dimension_numbers = #tpu.dot_dimension_numbers<[1], [0], [0], [1], [0, 0, 1, 1], [], []>} : vector<16x16xf32>, vector<16x32xf32>, vector<16x32xf32> -> vector<16x32xf32>
    %cst_6 = arith.constant 0.000000e+00 : f32
    %5 = vector.broadcast %cst_6 : f32 to vector<16x32xf32>
    %6 = arith.maximumf %4, %5 : vector<16x32xf32>
    %7 = arith.addf %6, %4 : vector<16x32xf32>
    %c0_7 = arith.constant 0 : index
    %c0_8 = arith.constant 0 : index
    %8 = vector.load %arg7[%c0_7, %c0_8] : memref<6x64xf32, #tpu.memory_space<vmem>>, vector<1x32xf32>
    %c1 = arith.constant 1 : index
    %c0_9 = arith.constant 0 : index
    %9 = vector.load %arg7[%c1, %c0_9] : memref<6x64xf32, #tpu.memory_space<vmem>>, vector<1x32xf32>
    %cst_10 = arith.constant dense<0.000000e+00> : vector<16xf32>
    %10 = vector.multi_reduction <add>, %7, %cst_10 [1] : vector<16x32xf32> to vector<16xf32>
    %11 = vector.shape_cast %10 : vector<16xf32> to vector<16x1xf32>
    %cst_11 = arith.constant 3.200000e+01 : f32
    %12 = vector.broadcast %cst_11 : f32 to vector<16x1xf32>
    %13 = arith.divf %11, %12 : vector<16x1xf32>
    %14 = vector.broadcast %13 : vector<16x1xf32> to vector<16x32xf32>
    %15 = arith.subf %7, %14 : vector<16x32xf32>
    %16 = arith.mulf %15, %15 : vector<16x32xf32>
    %cst_12 = arith.constant dense<0.000000e+00> : vector<16xf32>
    %17 = vector.multi_reduction <add>, %16, %cst_12 [1] : vector<16x32xf32> to vector<16xf32>
    %18 = vector.shape_cast %17 : vector<16xf32> to vector<16x1xf32>
    %cst_13 = arith.constant 3.200000e+01 : f32
    %19 = vector.broadcast %cst_13 : f32 to vector<16x1xf32>
    %20 = arith.divf %18, %19 : vector<16x1xf32>
    %21 = vector.broadcast %13 : vector<16x1xf32> to vector<16x32xf32>
    %22 = arith.subf %7, %21 : vector<16x32xf32>
    %cst_14 = arith.constant 9.99999974E-6 : f32
    %23 = vector.broadcast %cst_14 : f32 to vector<16x1xf32>
    %24 = arith.addf %20, %23 : vector<16x1xf32>
    %25 = math.rsqrt %24 : vector<16x1xf32>
    %26 = vector.broadcast %25 : vector<16x1xf32> to vector<16x32xf32>
    %27 = arith.mulf %22, %26 : vector<16x32xf32>
    %28 = vector.broadcast %8 : vector<1x32xf32> to vector<16x32xf32>
    %29 = arith.mulf %27, %28 : vector<16x32xf32>
    %30 = vector.broadcast %9 : vector<1x32xf32> to vector<16x32xf32>
    %31 = arith.addf %29, %30 : vector<16x32xf32>
    %c0_15 = arith.constant 0 : index
    %c0_16 = arith.constant 0 : index
    %32 = vector.load %arg3[%c0_15, %c0_16] : memref<32x32xf32, #tpu.memory_space<vmem>>, vector<32x32xf32>
    %cst_17 = arith.constant dense<0.000000e+00> : vector<32x16xf32>
    %33 = tpu.matmul %32, %31, %cst_17 {dimension_numbers = #tpu.dot_dimension_numbers<[1], [1], [0], [0], [0, 0, 1, 0], [], []>} : vector<32x32xf32>, vector<16x32xf32>, vector<32x16xf32> -> vector<32x16xf32>
    %c0_18 = arith.constant 0 : index
    %c0_19 = arith.constant 0 : index
    %34 = vector.load %arg4[%c0_18, %c0_19] : memref<32x1xf32, #tpu.memory_space<vmem>>, vector<32x1xf32>
    %35 = vector.broadcast %34 : vector<32x1xf32> to vector<32x16xf32>
    %36 = arith.addf %33, %35 : vector<32x16xf32>
    %c0_20 = arith.constant 0 : index
    %c0_21 = arith.constant 0 : index
    %37 = vector.load %arg5[%c0_20, %c0_21] : memref<32x64xf32, #tpu.memory_space<vmem>>, vector<32x64xf32>
    %cst_22 = arith.constant dense<0.000000e+00> : vector<16x64xf32>
    %38 = tpu.matmul %31, %37, %cst_22 {dimension_numbers = #tpu.dot_dimension_numbers<[1], [0], [0], [1], [0, 0, 1, 1], [], []>} : vector<16x32xf32>, vector<32x64xf32>, vector<16x64xf32> -> vector<16x64xf32>
    %c2 = arith.constant 2 : index
    %c0_23 = arith.constant 0 : index
    %39 = vector.load %arg7[%c2, %c0_23] : memref<6x64xf32, #tpu.memory_space<vmem>>, vector<1x64xf32>
    %40 = vector.broadcast %39 : vector<1x64xf32> to vector<16x64xf32>
    %41 = arith.addf %38, %40 : vector<16x64xf32>
    %42 = vector.extract_strided_slice %41 {offsets = [0, 0], sizes = [16, 32], strides = [1, 1]} : vector<16x64xf32> to vector<16x32xf32>
    %43 = vector.extract_strided_slice %41 {offsets = [0, 32], sizes = [16, 32], strides = [1, 1]} : vector<16x64xf32> to vector<16x32xf32>
    %cst_24 = arith.constant 0.000000e+00 : f32
    %44 = vector.broadcast %cst_24 : f32 to vector<16x16xf32>
    %45 = vector.extract_strided_slice %36 {offsets = [0, 0], sizes = [16, 4], strides = [1, 1]} : vector<32x16xf32> to vector<16x4xf32>
    %46 = vector.extract_strided_slice %42 {offsets = [0, 0], sizes = [4, 16], strides = [1, 1]} : vector<16x32xf32> to vector<4x16xf32>
    %cst_25 = arith.constant dense<0.000000e+00> : vector<16x16xf32>
    %47 = tpu.matmul %45, %46, %cst_25 {dimension_numbers = #tpu.dot_dimension_numbers<[1], [0], [0], [1], [0, 0, 1, 1], [], []>} : vector<16x4xf32>, vector<4x16xf32>, vector<16x16xf32> -> vector<16x16xf32>
    %48 = arith.addf %44, %47 : vector<16x16xf32>
    %49 = vector.extract_strided_slice %36 {offsets = [16, 0], sizes = [16, 4], strides = [1, 1]} : vector<32x16xf32> to vector<16x4xf32>
    %50 = vector.extract_strided_slice %42 {offsets = [0, 16], sizes = [4, 16], strides = [1, 1]} : vector<16x32xf32> to vector<4x16xf32>
    %cst_26 = arith.constant dense<0.000000e+00> : vector<16x16xf32>
    %51 = tpu.matmul %49, %50, %cst_26 {dimension_numbers = #tpu.dot_dimension_numbers<[1], [0], [0], [1], [0, 0, 1, 1], [], []>} : vector<16x4xf32>, vector<4x16xf32>, vector<16x16xf32> -> vector<16x16xf32>
    %52 = arith.addf %48, %51 : vector<16x16xf32>
    %cst_27 = arith.constant dense<0xFF800000> : vector<16xf32>
    %53 = vector.multi_reduction <maximumf>, %52, %cst_27 [1] : vector<16x16xf32> to vector<16xf32>
    %54 = vector.shape_cast %53 : vector<16xf32> to vector<16x1xf32>
    %55 = vector.broadcast %54 : vector<16x1xf32> to vector<16x16xf32>
    %56 = arith.subf %52, %55 : vector<16x16xf32>
    %57 = math.exp %56 : vector<16x16xf32>
    %cst_28 = arith.constant dense<0.000000e+00> : vector<16xf32>
    %58 = vector.multi_reduction <add>, %57, %cst_28 [1] : vector<16x16xf32> to vector<16xf32>
    %59 = vector.shape_cast %58 : vector<16xf32> to vector<16x1xf32>
    %60 = tpu.reciprocal %59 {approx = true} : vector<16x1xf32> -> vector<16x1xf32>
    %61 = arith.mulf %59, %60 : vector<16x1xf32>
    %cst_29 = arith.constant 2.000000e+00 : f32
    %62 = vector.broadcast %cst_29 : f32 to vector<16x1xf32>
    %63 = arith.subf %62, %61 : vector<16x1xf32>
    %64 = arith.mulf %60, %63 : vector<16x1xf32>
    %65 = vector.broadcast %64 : vector<16x1xf32> to vector<16x16xf32>
    %66 = arith.mulf %57, %65 : vector<16x16xf32>
    %67 = vector.extract_strided_slice %43 {offsets = [0, 0], sizes = [4, 16], strides = [1, 1]} : vector<16x32xf32> to vector<4x16xf32>
    %cst_30 = arith.constant dense<0.000000e+00> : vector<16x4xf32>
    %68 = tpu.matmul %66, %67, %cst_30 {dimension_numbers = #tpu.dot_dimension_numbers<[1], [1], [0], [0], [0, 0, 1, 0], [], []>} : vector<16x16xf32>, vector<4x16xf32>, vector<16x4xf32> -> vector<16x4xf32>
    %69 = vector.extract_strided_slice %68 {offsets = [0, 0], sizes = [4, 4], strides = [1, 1]} : vector<16x4xf32> to vector<4x4xf32>
    %70 = vector.extract_strided_slice %68 {offsets = [4, 0], sizes = [4, 4], strides = [1, 1]} : vector<16x4xf32> to vector<4x4xf32>
    %71 = vector.extract_strided_slice %68 {offsets = [8, 0], sizes = [4, 4], strides = [1, 1]} : vector<16x4xf32> to vector<4x4xf32>
    %72 = vector.extract_strided_slice %68 {offsets = [12, 0], sizes = [4, 4], strides = [1, 1]} : vector<16x4xf32> to vector<4x4xf32>
    %73 = vector.extract_strided_slice %43 {offsets = [0, 16], sizes = [4, 16], strides = [1, 1]} : vector<16x32xf32> to vector<4x16xf32>
    %cst_31 = arith.constant dense<0.000000e+00> : vector<16x4xf32>
    %74 = tpu.matmul %66, %73, %cst_31 {dimension_numbers = #tpu.dot_dimension_numbers<[1], [1], [0], [0], [0, 0, 1, 0], [], []>} : vector<16x16xf32>, vector<4x16xf32>, vector<16x4xf32> -> vector<16x4xf32>
    %75 = vector.extract_strided_slice %74 {offsets = [0, 0], sizes = [4, 4], strides = [1, 1]} : vector<16x4xf32> to vector<4x4xf32>
    %76 = vector.extract_strided_slice %74 {offsets = [4, 0], sizes = [4, 4], strides = [1, 1]} : vector<16x4xf32> to vector<4x4xf32>
    %77 = vector.extract_strided_slice %74 {offsets = [8, 0], sizes = [4, 4], strides = [1, 1]} : vector<16x4xf32> to vector<4x4xf32>
    %78 = vector.extract_strided_slice %74 {offsets = [12, 0], sizes = [4, 4], strides = [1, 1]} : vector<16x4xf32> to vector<4x4xf32>
    %79 = tpu.concatenate %69, %70, %71, %72, %75, %76, %77, %78 in 1 : vector<4x4xf32>, vector<4x4xf32>, vector<4x4xf32>, vector<4x4xf32>, vector<4x4xf32>, vector<4x4xf32>, vector<4x4xf32>, vector<4x4xf32> -> vector<4x32xf32>
    %cst_32 = arith.constant 0.000000e+00 : f32
    %80 = vector.broadcast %cst_32 : f32 to vector<16x16xf32>
    %81 = vector.extract_strided_slice %36 {offsets = [0, 4], sizes = [16, 4], strides = [1, 1]} : vector<32x16xf32> to vector<16x4xf32>
    %82 = vector.extract_strided_slice %42 {offsets = [4, 0], sizes = [4, 16], strides = [1, 1]} : vector<16x32xf32> to vector<4x16xf32>
    %cst_33 = arith.constant dense<0.000000e+00> : vector<16x16xf32>
    %83 = tpu.matmul %81, %82, %cst_33 {dimension_numbers = #tpu.dot_dimension_numbers<[1], [0], [0], [1], [0, 0, 1, 1], [], []>} : vector<16x4xf32>, vector<4x16xf32>, vector<16x16xf32> -> vector<16x16xf32>
    %84 = arith.addf %80, %83 : vector<16x16xf32>
    %85 = vector.extract_strided_slice %36 {offsets = [16, 4], sizes = [16, 4], strides = [1, 1]} : vector<32x16xf32> to vector<16x4xf32>
    %86 = vector.extract_strided_slice %42 {offsets = [4, 16], sizes = [4, 16], strides = [1, 1]} : vector<16x32xf32> to vector<4x16xf32>
    %cst_34 = arith.constant dense<0.000000e+00> : vector<16x16xf32>
    %87 = tpu.matmul %85, %86, %cst_34 {dimension_numbers = #tpu.dot_dimension_numbers<[1], [0], [0], [1], [0, 0, 1, 1], [], []>} : vector<16x4xf32>, vector<4x16xf32>, vector<16x16xf32> -> vector<16x16xf32>
    %88 = arith.addf %84, %87 : vector<16x16xf32>
    %cst_35 = arith.constant dense<0xFF800000> : vector<16xf32>
    %89 = vector.multi_reduction <maximumf>, %88, %cst_35 [1] : vector<16x16xf32> to vector<16xf32>
    %90 = vector.shape_cast %89 : vector<16xf32> to vector<16x1xf32>
    %91 = vector.broadcast %90 : vector<16x1xf32> to vector<16x16xf32>
    %92 = arith.subf %88, %91 : vector<16x16xf32>
    %93 = math.exp %92 : vector<16x16xf32>
    %cst_36 = arith.constant dense<0.000000e+00> : vector<16xf32>
    %94 = vector.multi_reduction <add>, %93, %cst_36 [1] : vector<16x16xf32> to vector<16xf32>
    %95 = vector.shape_cast %94 : vector<16xf32> to vector<16x1xf32>
    %96 = tpu.reciprocal %95 {approx = true} : vector<16x1xf32> -> vector<16x1xf32>
    %97 = arith.mulf %95, %96 : vector<16x1xf32>
    %cst_37 = arith.constant 2.000000e+00 : f32
    %98 = vector.broadcast %cst_37 : f32 to vector<16x1xf32>
    %99 = arith.subf %98, %97 : vector<16x1xf32>
    %100 = arith.mulf %96, %99 : vector<16x1xf32>
    %101 = vector.broadcast %100 : vector<16x1xf32> to vector<16x16xf32>
    %102 = arith.mulf %93, %101 : vector<16x16xf32>
    %103 = vector.extract_strided_slice %43 {offsets = [4, 0], sizes = [4, 16], strides = [1, 1]} : vector<16x32xf32> to vector<4x16xf32>
    %cst_38 = arith.constant dense<0.000000e+00> : vector<16x4xf32>
    %104 = tpu.matmul %102, %103, %cst_38 {dimension_numbers = #tpu.dot_dimension_numbers<[1], [1], [0], [0], [0, 0, 1, 0], [], []>} : vector<16x16xf32>, vector<4x16xf32>, vector<16x4xf32> -> vector<16x4xf32>
    %105 = vector.extract_strided_slice %104 {offsets = [0, 0], sizes = [4, 4], strides = [1, 1]} : vector<16x4xf32> to vector<4x4xf32>
    %106 = vector.extract_strided_slice %104 {offsets = [4, 0], sizes = [4, 4], strides = [1, 1]} : vector<16x4xf32> to vector<4x4xf32>
    %107 = vector.extract_strided_slice %104 {offsets = [8, 0], sizes = [4, 4], strides = [1, 1]} : vector<16x4xf32> to vector<4x4xf32>
    %108 = vector.extract_strided_slice %104 {offsets = [12, 0], sizes = [4, 4], strides = [1, 1]} : vector<16x4xf32> to vector<4x4xf32>
    %109 = vector.extract_strided_slice %43 {offsets = [4, 16], sizes = [4, 16], strides = [1, 1]} : vector<16x32xf32> to vector<4x16xf32>
    %cst_39 = arith.constant dense<0.000000e+00> : vector<16x4xf32>
    %110 = tpu.matmul %102, %109, %cst_39 {dimension_numbers = #tpu.dot_dimension_numbers<[1], [1], [0], [0], [0, 0, 1, 0], [], []>} : vector<16x16xf32>, vector<4x16xf32>, vector<16x4xf32> -> vector<16x4xf32>
    %111 = vector.extract_strided_slice %110 {offsets = [0, 0], sizes = [4, 4], strides = [1, 1]} : vector<16x4xf32> to vector<4x4xf32>
    %112 = vector.extract_strided_slice %110 {offsets = [4, 0], sizes = [4, 4], strides = [1, 1]} : vector<16x4xf32> to vector<4x4xf32>
    %113 = vector.extract_strided_slice %110 {offsets = [8, 0], sizes = [4, 4], strides = [1, 1]} : vector<16x4xf32> to vector<4x4xf32>
    %114 = vector.extract_strided_slice %110 {offsets = [12, 0], sizes = [4, 4], strides = [1, 1]} : vector<16x4xf32> to vector<4x4xf32>
    %115 = tpu.concatenate %105, %106, %107, %108, %111, %112, %113, %114 in 1 : vector<4x4xf32>, vector<4x4xf32>, vector<4x4xf32>, vector<4x4xf32>, vector<4x4xf32>, vector<4x4xf32>, vector<4x4xf32>, vector<4x4xf32> -> vector<4x32xf32>
    %cst_40 = arith.constant 0.000000e+00 : f32
    %116 = vector.broadcast %cst_40 : f32 to vector<16x16xf32>
    %117 = vector.extract_strided_slice %36 {offsets = [0, 8], sizes = [16, 4], strides = [1, 1]} : vector<32x16xf32> to vector<16x4xf32>
    %118 = vector.extract_strided_slice %42 {offsets = [8, 0], sizes = [4, 16], strides = [1, 1]} : vector<16x32xf32> to vector<4x16xf32>
    %cst_41 = arith.constant dense<0.000000e+00> : vector<16x16xf32>
    %119 = tpu.matmul %117, %118, %cst_41 {dimension_numbers = #tpu.dot_dimension_numbers<[1], [0], [0], [1], [0, 0, 1, 1], [], []>} : vector<16x4xf32>, vector<4x16xf32>, vector<16x16xf32> -> vector<16x16xf32>
    %120 = arith.addf %116, %119 : vector<16x16xf32>
    %121 = vector.extract_strided_slice %36 {offsets = [16, 8], sizes = [16, 4], strides = [1, 1]} : vector<32x16xf32> to vector<16x4xf32>
    %122 = vector.extract_strided_slice %42 {offsets = [8, 16], sizes = [4, 16], strides = [1, 1]} : vector<16x32xf32> to vector<4x16xf32>
    %cst_42 = arith.constant dense<0.000000e+00> : vector<16x16xf32>
    %123 = tpu.matmul %121, %122, %cst_42 {dimension_numbers = #tpu.dot_dimension_numbers<[1], [0], [0], [1], [0, 0, 1, 1], [], []>} : vector<16x4xf32>, vector<4x16xf32>, vector<16x16xf32> -> vector<16x16xf32>
    %124 = arith.addf %120, %123 : vector<16x16xf32>
    %cst_43 = arith.constant dense<0xFF800000> : vector<16xf32>
    %125 = vector.multi_reduction <maximumf>, %124, %cst_43 [1] : vector<16x16xf32> to vector<16xf32>
    %126 = vector.shape_cast %125 : vector<16xf32> to vector<16x1xf32>
    %127 = vector.broadcast %126 : vector<16x1xf32> to vector<16x16xf32>
    %128 = arith.subf %124, %127 : vector<16x16xf32>
    %129 = math.exp %128 : vector<16x16xf32>
    %cst_44 = arith.constant dense<0.000000e+00> : vector<16xf32>
    %130 = vector.multi_reduction <add>, %129, %cst_44 [1] : vector<16x16xf32> to vector<16xf32>
    %131 = vector.shape_cast %130 : vector<16xf32> to vector<16x1xf32>
    %132 = tpu.reciprocal %131 {approx = true} : vector<16x1xf32> -> vector<16x1xf32>
    %133 = arith.mulf %131, %132 : vector<16x1xf32>
    %cst_45 = arith.constant 2.000000e+00 : f32
    %134 = vector.broadcast %cst_45 : f32 to vector<16x1xf32>
    %135 = arith.subf %134, %133 : vector<16x1xf32>
    %136 = arith.mulf %132, %135 : vector<16x1xf32>
    %137 = vector.broadcast %136 : vector<16x1xf32> to vector<16x16xf32>
    %138 = arith.mulf %129, %137 : vector<16x16xf32>
    %139 = vector.extract_strided_slice %43 {offsets = [8, 0], sizes = [4, 16], strides = [1, 1]} : vector<16x32xf32> to vector<4x16xf32>
    %cst_46 = arith.constant dense<0.000000e+00> : vector<16x4xf32>
    %140 = tpu.matmul %138, %139, %cst_46 {dimension_numbers = #tpu.dot_dimension_numbers<[1], [1], [0], [0], [0, 0, 1, 0], [], []>} : vector<16x16xf32>, vector<4x16xf32>, vector<16x4xf32> -> vector<16x4xf32>
    %141 = vector.extract_strided_slice %140 {offsets = [0, 0], sizes = [4, 4], strides = [1, 1]} : vector<16x4xf32> to vector<4x4xf32>
    %142 = vector.extract_strided_slice %140 {offsets = [4, 0], sizes = [4, 4], strides = [1, 1]} : vector<16x4xf32> to vector<4x4xf32>
    %143 = vector.extract_strided_slice %140 {offsets = [8, 0], sizes = [4, 4], strides = [1, 1]} : vector<16x4xf32> to vector<4x4xf32>
    %144 = vector.extract_strided_slice %140 {offsets = [12, 0], sizes = [4, 4], strides = [1, 1]} : vector<16x4xf32> to vector<4x4xf32>
    %145 = vector.extract_strided_slice %43 {offsets = [8, 16], sizes = [4, 16], strides = [1, 1]} : vector<16x32xf32> to vector<4x16xf32>
    %cst_47 = arith.constant dense<0.000000e+00> : vector<16x4xf32>
    %146 = tpu.matmul %138, %145, %cst_47 {dimension_numbers = #tpu.dot_dimension_numbers<[1], [1], [0], [0], [0, 0, 1, 0], [], []>} : vector<16x16xf32>, vector<4x16xf32>, vector<16x4xf32> -> vector<16x4xf32>
    %147 = vector.extract_strided_slice %146 {offsets = [0, 0], sizes = [4, 4], strides = [1, 1]} : vector<16x4xf32> to vector<4x4xf32>
    %148 = vector.extract_strided_slice %146 {offsets = [4, 0], sizes = [4, 4], strides = [1, 1]} : vector<16x4xf32> to vector<4x4xf32>
    %149 = vector.extract_strided_slice %146 {offsets = [8, 0], sizes = [4, 4], strides = [1, 1]} : vector<16x4xf32> to vector<4x4xf32>
    %150 = vector.extract_strided_slice %146 {offsets = [12, 0], sizes = [4, 4], strides = [1, 1]} : vector<16x4xf32> to vector<4x4xf32>
    %151 = tpu.concatenate %141, %142, %143, %144, %147, %148, %149, %150 in 1 : vector<4x4xf32>, vector<4x4xf32>, vector<4x4xf32>, vector<4x4xf32>, vector<4x4xf32>, vector<4x4xf32>, vector<4x4xf32>, vector<4x4xf32> -> vector<4x32xf32>
    %cst_48 = arith.constant 0.000000e+00 : f32
    %152 = vector.broadcast %cst_48 : f32 to vector<16x16xf32>
    %153 = vector.extract_strided_slice %36 {offsets = [0, 12], sizes = [16, 4], strides = [1, 1]} : vector<32x16xf32> to vector<16x4xf32>
    %154 = vector.extract_strided_slice %42 {offsets = [12, 0], sizes = [4, 16], strides = [1, 1]} : vector<16x32xf32> to vector<4x16xf32>
    %cst_49 = arith.constant dense<0.000000e+00> : vector<16x16xf32>
    %155 = tpu.matmul %153, %154, %cst_49 {dimension_numbers = #tpu.dot_dimension_numbers<[1], [0], [0], [1], [0, 0, 1, 1], [], []>} : vector<16x4xf32>, vector<4x16xf32>, vector<16x16xf32> -> vector<16x16xf32>
    %156 = arith.addf %152, %155 : vector<16x16xf32>
    %157 = vector.extract_strided_slice %36 {offsets = [16, 12], sizes = [16, 4], strides = [1, 1]} : vector<32x16xf32> to vector<16x4xf32>
    %158 = vector.extract_strided_slice %42 {offsets = [12, 16], sizes = [4, 16], strides = [1, 1]} : vector<16x32xf32> to vector<4x16xf32>
    %cst_50 = arith.constant dense<0.000000e+00> : vector<16x16xf32>
    %159 = tpu.matmul %157, %158, %cst_50 {dimension_numbers = #tpu.dot_dimension_numbers<[1], [0], [0], [1], [0, 0, 1, 1], [], []>} : vector<16x4xf32>, vector<4x16xf32>, vector<16x16xf32> -> vector<16x16xf32>
    %160 = arith.addf %156, %159 : vector<16x16xf32>
    %cst_51 = arith.constant dense<0xFF800000> : vector<16xf32>
    %161 = vector.multi_reduction <maximumf>, %160, %cst_51 [1] : vector<16x16xf32> to vector<16xf32>
    %162 = vector.shape_cast %161 : vector<16xf32> to vector<16x1xf32>
    %163 = vector.broadcast %162 : vector<16x1xf32> to vector<16x16xf32>
    %164 = arith.subf %160, %163 : vector<16x16xf32>
    %165 = math.exp %164 : vector<16x16xf32>
    %cst_52 = arith.constant dense<0.000000e+00> : vector<16xf32>
    %166 = vector.multi_reduction <add>, %165, %cst_52 [1] : vector<16x16xf32> to vector<16xf32>
    %167 = vector.shape_cast %166 : vector<16xf32> to vector<16x1xf32>
    %168 = tpu.reciprocal %167 {approx = true} : vector<16x1xf32> -> vector<16x1xf32>
    %169 = arith.mulf %167, %168 : vector<16x1xf32>
    %cst_53 = arith.constant 2.000000e+00 : f32
    %170 = vector.broadcast %cst_53 : f32 to vector<16x1xf32>
    %171 = arith.subf %170, %169 : vector<16x1xf32>
    %172 = arith.mulf %168, %171 : vector<16x1xf32>
    %173 = vector.broadcast %172 : vector<16x1xf32> to vector<16x16xf32>
    %174 = arith.mulf %165, %173 : vector<16x16xf32>
    %175 = vector.extract_strided_slice %43 {offsets = [12, 0], sizes = [4, 16], strides = [1, 1]} : vector<16x32xf32> to vector<4x16xf32>
    %cst_54 = arith.constant dense<0.000000e+00> : vector<16x4xf32>
    %176 = tpu.matmul %174, %175, %cst_54 {dimension_numbers = #tpu.dot_dimension_numbers<[1], [1], [0], [0], [0, 0, 1, 0], [], []>} : vector<16x16xf32>, vector<4x16xf32>, vector<16x4xf32> -> vector<16x4xf32>
    %177 = vector.extract_strided_slice %176 {offsets = [0, 0], sizes = [4, 4], strides = [1, 1]} : vector<16x4xf32> to vector<4x4xf32>
    %178 = vector.extract_strided_slice %176 {offsets = [4, 0], sizes = [4, 4], strides = [1, 1]} : vector<16x4xf32> to vector<4x4xf32>
    %179 = vector.extract_strided_slice %176 {offsets = [8, 0], sizes = [4, 4], strides = [1, 1]} : vector<16x4xf32> to vector<4x4xf32>
    %180 = vector.extract_strided_slice %176 {offsets = [12, 0], sizes = [4, 4], strides = [1, 1]} : vector<16x4xf32> to vector<4x4xf32>
    %181 = vector.extract_strided_slice %43 {offsets = [12, 16], sizes = [4, 16], strides = [1, 1]} : vector<16x32xf32> to vector<4x16xf32>
    %cst_55 = arith.constant dense<0.000000e+00> : vector<16x4xf32>
    %182 = tpu.matmul %174, %181, %cst_55 {dimension_numbers = #tpu.dot_dimension_numbers<[1], [1], [0], [0], [0, 0, 1, 0], [], []>} : vector<16x16xf32>, vector<4x16xf32>, vector<16x4xf32> -> vector<16x4xf32>
    %183 = vector.extract_strided_slice %182 {offsets = [0, 0], sizes = [4, 4], strides = [1, 1]} : vector<16x4xf32> to vector<4x4xf32>
    %184 = vector.extract_strided_slice %182 {offsets = [4, 0], sizes = [4, 4], strides = [1, 1]} : vector<16x4xf32> to vector<4x4xf32>
    %185 = vector.extract_strided_slice %182 {offsets = [8, 0], sizes = [4, 4], strides = [1, 1]} : vector<16x4xf32> to vector<4x4xf32>
    %186 = vector.extract_strided_slice %182 {offsets = [12, 0], sizes = [4, 4], strides = [1, 1]} : vector<16x4xf32> to vector<4x4xf32>
    %187 = tpu.concatenate %177, %178, %179, %180, %183, %184, %185, %186 in 1 : vector<4x4xf32>, vector<4x4xf32>, vector<4x4xf32>, vector<4x4xf32>, vector<4x4xf32>, vector<4x4xf32>, vector<4x4xf32>, vector<4x4xf32> -> vector<4x32xf32>
    %188 = tpu.concatenate %79, %115, %151, %187 in 0 : vector<4x32xf32>, vector<4x32xf32>, vector<4x32xf32>, vector<4x32xf32> -> vector<16x32xf32>
    %c0_56 = arith.constant 0 : index
    %c0_57 = arith.constant 0 : index
    %189 = vector.load %arg6[%c0_56, %c0_57] : memref<32x32xf32, #tpu.memory_space<vmem>>, vector<32x32xf32>
    %cst_58 = arith.constant dense<0.000000e+00> : vector<16x32xf32>
    %190 = tpu.matmul %188, %189, %cst_58 {dimension_numbers = #tpu.dot_dimension_numbers<[1], [0], [0], [1], [0, 0, 1, 1], [], []>} : vector<16x32xf32>, vector<32x32xf32>, vector<16x32xf32> -> vector<16x32xf32>
    %c3 = arith.constant 3 : index
    %c0_59 = arith.constant 0 : index
    %191 = vector.load %arg7[%c3, %c0_59] : memref<6x64xf32, #tpu.memory_space<vmem>>, vector<1x32xf32>
    %192 = vector.broadcast %191 : vector<1x32xf32> to vector<16x32xf32>
    %193 = arith.addf %190, %192 : vector<16x32xf32>
    %c4 = arith.constant 4 : index
    %c0_60 = arith.constant 0 : index
    %194 = vector.load %arg7[%c4, %c0_60] : memref<6x64xf32, #tpu.memory_space<vmem>>, vector<1x32xf32>
    %c5 = arith.constant 5 : index
    %c0_61 = arith.constant 0 : index
    %195 = vector.load %arg7[%c5, %c0_61] : memref<6x64xf32, #tpu.memory_space<vmem>>, vector<1x32xf32>
    %cst_62 = arith.constant dense<0.000000e+00> : vector<16xf32>
    %196 = vector.multi_reduction <add>, %193, %cst_62 [1] : vector<16x32xf32> to vector<16xf32>
    %197 = vector.shape_cast %196 : vector<16xf32> to vector<16x1xf32>
    %cst_63 = arith.constant 3.200000e+01 : f32
    %198 = vector.broadcast %cst_63 : f32 to vector<16x1xf32>
    %199 = arith.divf %197, %198 : vector<16x1xf32>
    %200 = vector.broadcast %199 : vector<16x1xf32> to vector<16x32xf32>
    %201 = arith.subf %193, %200 : vector<16x32xf32>
    %202 = arith.mulf %201, %201 : vector<16x32xf32>
    %cst_64 = arith.constant dense<0.000000e+00> : vector<16xf32>
    %203 = vector.multi_reduction <add>, %202, %cst_64 [1] : vector<16x32xf32> to vector<16xf32>
    %204 = vector.shape_cast %203 : vector<16xf32> to vector<16x1xf32>
    %cst_65 = arith.constant 3.200000e+01 : f32
    %205 = vector.broadcast %cst_65 : f32 to vector<16x1xf32>
    %206 = arith.divf %204, %205 : vector<16x1xf32>
    %207 = vector.broadcast %199 : vector<16x1xf32> to vector<16x32xf32>
    %208 = arith.subf %193, %207 : vector<16x32xf32>
    %cst_66 = arith.constant 9.99999974E-6 : f32
    %209 = vector.broadcast %cst_66 : f32 to vector<16x1xf32>
    %210 = arith.addf %206, %209 : vector<16x1xf32>
    %211 = math.rsqrt %210 : vector<16x1xf32>
    %212 = vector.broadcast %211 : vector<16x1xf32> to vector<16x32xf32>
    %213 = arith.mulf %208, %212 : vector<16x32xf32>
    %214 = vector.broadcast %194 : vector<1x32xf32> to vector<16x32xf32>
    %215 = arith.mulf %213, %214 : vector<16x32xf32>
    %216 = vector.broadcast %195 : vector<1x32xf32> to vector<16x32xf32>
    %217 = arith.addf %215, %216 : vector<16x32xf32>
    %c0_67 = arith.constant 0 : index
    %c0_68 = arith.constant 0 : index
    %218 = vector.load %arg8[%c0_67, %c0_68] : memref<16x32xf32, #tpu.memory_space<vmem>>, vector<16x32xf32>
    tpu.vector_store %arg8[%c0_67, %c0_68], %217 {strides = array<i32>} : memref<16x32xf32, #tpu.memory_space<vmem>>, vector<16x32xf32>,
    return
  }
}

</mosaic_0001>

<bundles_post_ra>
// kernel: gnn_forward.1
= control target key start
LH: loop header
LB: loop body
LE: loop exit
PB: predicated region body
PF: predicated region fallthrough
CT: control target
= control target key end

     0   :  { %13 = vsyncpa [#allocation3], 0  ;;  %s3108_s0 = inlined_call_operand.hbm [shape: f32[16,16], index: 0, kind: input, shape index: {}]   ;;  %s3109_s1 = inlined_call_operand.vmem [shape: f32[16,8], index: 1, kind: input, shape index: {}]   ;;  %s3110_s2 = inlined_call_operand.hbm [shape: f32[8,32], index: 2, kind: input, shape index: {}]   ;;  %s3111_s3 = inlined_call_operand.vmem [shape: f32[32,32], index: 3, kind: input, shape index: {}]   ;;  %s3112_s4 = inlined_call_operand.vmem [shape: f32[32,1], index: 4, kind: input, shape index: {}]   ;;  %s3113_s5 = inlined_call_operand.vmem [shape: f32[32,64], index: 5, kind: input, shape index: {}]   ;;  %s3114_s6 = inlined_call_operand.hbm [shape: f32[32,32], index: 6, kind: input, shape index: {}]   ;;  %s3115_s7 = inlined_call_operand.hbm [shape: f32[6,64], index: 7, kind: input, shape index: {}]   ;;  %s3116_s8 = inlined_call_operand.hbm [shape: f32[16,32], index: 8, kind: output, shape index: {}]  }
   0x1   :  { %14 = vsyncpa [#allocation6], 0 }
   0x2   :  { %15 = vsyncpa [#allocation9], 0 }
   0x3   :  { %16 = vsyncpa [#allocation4], 0  ;;  %s2711_s27 = smov [#allocation5]   ;;  %s2712_s29 = smov [#allocation2]  }
   0x4   :  { %s37_s28 = sshll.u32 %s2711_s27, 4  ;;  %s22_s30 = sshll.u32 %s2712_s29, 4  ;;  %s38_s28 = int_to_ptr.vmem [resolvable:$true] %s37_s28  ;;  %s23_s30 = int_to_ptr.vmem [resolvable:$true] %s22_s30 }
   0x5   :  { %s2611_s9 = scalar_lea.vmem %s38_s28, 128  ;;  %p2616_p1 = scmp.lt.s32.totalorder %s38_s28, %s38_s28 }
   0x6   :  { %p2612_p0 = scmp.ne.s32.totalorder %s38_s28, %s2611_s9  ;;  %p2617_p2 = scmp.lt.s32.totalorder %s2611_s9, %s2611_s9 }
   0x8   :  { %p2618_p3 = por %p2617_p2, %p2616_p1 }
   0xa   :  { %p2619_p4 = pnand %p2618_p3, %p2612_p0 }
   0xc   :  { %2622 = shalt.err (!%p2619_p4)
}
   0xd   :  { %40 = dma.hbm_to_vmem [thread:$0]  %s3110_s2, 128, %s38_s28, [#allocation6]  }
   0xe   :  { %s2631_s12 = scalar_lea.vmem %s23_s30, 256  ;;  %p2636_p6 = scmp.lt.s32.totalorder %s23_s30, %s23_s30 }
   0xf   :  { %p2632_p5 = scmp.ne.s32.totalorder %s23_s30, %s2631_s12  ;;  %p2637_p7 = scmp.lt.s32.totalorder %s2631_s12, %s2631_s12 }
  0x11   :  { %p2638_p8 = por %p2637_p7, %p2636_p6 }
  0x13   :  { %p2639_p9 = pnand %p2638_p8, %p2632_p5 }
  0x15   :  { %2642 = shalt.err (!%p2639_p9)
}
  0x16   :  { %s2713_s13 = smov 128   ;;  %s2714_s14 = smov 8  }
  0x17   :  { %28 = dma.hbm_to_vmem [thread:$0]  %s3108_s0, 256, %s23_s30, [#allocation3], %s2713_s13, %s2713_s13, %s2714_s14  }
  0x18   :  { %s2715_s17 = smov [#allocation7]   ;;  %s2716_s19 = smov [#allocation8]  }
  0x19   :  { %s52_s18 = sshll.u32 %s2715_s17, 4  ;;  %s65_s2 = sshll.u32 %s2716_s19, 4  ;;  %s53_s18 = int_to_ptr.vmem [resolvable:$true] %s52_s18  ;;  %s66_s2 = int_to_ptr.vmem [resolvable:$true] %s65_s2 }
  0x1a   :  { %s2651_s20 = scalar_lea.vmem %s53_s18, 512  ;;  %p2656_p11 = scmp.lt.s32.totalorder %s53_s18, %s53_s18 }
  0x1b   :  { %p2652_p10 = scmp.ne.s32.totalorder %s53_s18, %s2651_s20  ;;  %p2657_p12 = scmp.lt.s32.totalorder %s2651_s20, %s2651_s20 }
  0x1d   :  { %p2658_p13 = por %p2657_p12, %p2656_p11 }
  0x1f   :  { %p2659_p0 = pnand %p2658_p13, %p2652_p10 }
  0x21   :  { %2662 = shalt.err (!%p2659_p0)
}
  0x22   :  { %58 = dma.hbm_to_vmem [thread:$0]  %s3114_s6, 512, %s53_s18, [#allocation6], %s2713_s13, %s2713_s13, %s2714_s14  }
  0x23   :  { %s2671_s0 = scalar_lea.vmem %s66_s2, 128  ;;  %p2676_p2 = scmp.lt.s32.totalorder %s66_s2, %s66_s2 }
  0x24   :  { %p2672_p1 = scmp.ne.s32.totalorder %s66_s2, %s2671_s0  ;;  %p2677_p3 = scmp.lt.s32.totalorder %s2671_s0, %s2671_s0 }
  0x26   :  { %p2678_p4 = por %p2677_p3, %p2676_p2 }
  0x28   :  { %p2679_p5 = pnand %p2678_p4, %p2672_p1 }
  0x2a   :  { %2682 = shalt.err (!%p2679_p5)
}
  0x2b   :  { %68 = dma.hbm_to_vmem [thread:$0]  %s3115_s7, 128, %s66_s2, [#allocation9]  }
  0x2c   :  { %2703 = dma.done.wait [#allocation3], 256  }
  0x2d   :  { %2704 = vsyncadd [#allocation3], 4294967040 }
  0x2e   :  { %2705 = dma.done.wait [#allocation6], 640  }
  0x2f   :  { %2706 = vsyncadd [#allocation6], 4294966656 }
  0x30   :  { %2707 = dma.done.wait [#allocation9], 128  }
  0x31   :  { %2708 = vsyncadd [#allocation9], 4294967168  ;;  %vm84_vm0 = vcmask 64512   ;;  %v83_v0 = vld [vmem:[#allocation5] sm:$0xff]  ;;  %v81_v1 = vld [vmem:[%s3109_s1] sm:$0xff]  ;;  %vm168_vm1 = vcmask 130048  }
  0x32   :  { %v82_v2 = vld [vmem:[%s3109_s1 + $0x8] sm:$0xff]  ;;  %2417 = vmatprep.subr.mxu0 %v83_v0  ;;  %2419 = vmatprep.mubr.msk.f32.mxu0 %vm84_vm0, %v81_v1  ;;  %v166_v3 = vld [vmem:[#allocation2] sm:$0xff]  ;;  %vm256_vm2 = vcmask 261120   ;;  %v430_v25 = vld [vmem:[%s3113_s5 + $0x18] sm:$0xff]  ;;  %v2717_v32 = vmov 0   ;;  %vm521_vm3 = vcmask 1043456  }
  0x33   :  { %2418 = vmatpush3.msra.mxu0 %v83_v0  ;;  %v167_v6 = vld [vmem:[#allocation2 + $0x8] sm:$0xff]  ;;  %v429_v26 = vld [vmem:[%s3113_s5 + $0x10] sm:$0xff]  ;;  %2439 = vmatprep.subr.mxu1 %v430_v25  ;;  %v427_v28 = vld [vmem:[%s3113_s5] sm:$0xff]  ;;  %s2718_s25 = smov 112   ;;  %vm514_vm4 = vcmask 31744   ;;  %s2720_s26 = smov 80  }
  0x34   :  { %2420 = vmatmul.mubr.msk.f32.vlgmr.msra.gmra.mxu0 %vm84_vm0, %v82_v2  ;;  %2440 = vmatpush3.msra.mxu1 %v430_v25  ;;  %v428_v27 = vld [vmem:[%s3113_s5 + $0x8] sm:$0xff]  ;;  %v296_v29 = vld [vmem:[%s3111_s3] sm:$0xff]  ;;  %v302_v30 = vld [vmem:[%s3112_s4 + $0x10] sm:$0xff]  ;;  %s2721_s27 = smov 124   ;;  %s2722_s1 = smov 120   ;;  %vm905_vm5 = vcmask 97280  }
  0x35   :  { %2426 = vmatprep.mubr.msk.f32.mxu0 %vm168_vm1, %v166_v3  ;;  %2441 = vmatprep.subr.mxu1 %v429_v26  ;;  %v300_v31 = vld [vmem:[%s3112_s4] sm:$0xff]  ;;  %v301_v33 = vld [vmem:[%s3112_s4 + $0x8] sm:$0xff]  ;;  %v303_v34 = vld [vmem:[%s3112_s4 + $0x18] sm:$0xff]  ;;  %s2723_s7 = smov 116   ;;  %s2724_s28 = smov 4   ;;  %vm908_vm6 = vcmask 162816  }
  0x36   :  { %2442 = vmatpush3.msra.mxu1 %v429_v26  ;;  %2562 = vset.pattern.permute.xlu1 %v2717_v32  ;;  %v2280_v42 = vld [vmem:[#allocation8] ss:$0 sm:$0xff]  ;;  %v2281_v44 = vld [vmem:[#allocation8 + $0x1] ss:$0 sm:$0xff]  ;;  %v297_v51 = vld [vmem:[%s3111_s3 + $0x8] sm:$0xff]  ;;  %s2725_s29 = smov 12  }
  0x37   :  { %2443 = vmatprep.subr.mxu1 %v428_v27  ;;  %2561 = vset.pattern.permute.xlu0 %v2717_v32  ;;  %v298_v52 = vld [vmem:[%s3111_s3 + $0x10] sm:$0xff]  ;;  %v299_v53 = vld [vmem:[%s3111_s3 + $0x18] sm:$0xff]  ;;  %s2719_s3 = smov 96   ;;  %s2726_s30 = smov 16   ;;  %vm910_vm7 = vcmask 195584   ;;  %vm912_vm8 = vcmask 228352  }
  0x38   :  { %2444 = vmatpush3.msra.mxu1 %v428_v27  ;;  %v2288_v54 = vld [vmem:[#allocation8 + $0x2] ss:$0 sm:$0xff]  ;;  %s2727_s9 = smov 20   ;;  %s2728_s10 = smov 24  }
  0x39   :  { %2445 = vmatprep.subr.mxu1 %v427_v28  ;;  %s2729_s11 = smov 28   ;;  %s2730_s12 = smov [#allocation10]  }
  0x3a   :  { %2446 = vmatpush3.msra.mxu1 %v427_v28  ;;  %s2262_s15 = sshll.u32 %s2730_s12, 4  ;;  %s2263_s15 = int_to_ptr.vmem [resolvable:$true] %s2262_s15 }
  0x3b   :  { %s2683_s16 = scalar_lea.vmem %s2263_s15, 256  ;;  %p2688_p7 = scmp.lt.s32.totalorder %s2263_s15, %s2263_s15 }
  0x3c   :  { %p2684_p6 = scmp.ne.s32.totalorder %s2263_s15, %s2683_s16  ;;  %p2689_p8 = scmp.lt.s32.totalorder %s2683_s16, %s2683_s16 }
  0x3e   :  { %p2690_p9 = por %p2689_p8, %p2688_p7 }
  0x40   :  { %p2691_p10 = pnand %p2690_p9, %p2684_p6 }
  0xf4   :  { %v2421_v4 = vpop.f32.mrf.mxu0 }
  0xf5   :  { %2422 = vmatprep.subr.mxu0 %v2421_v4 }
  0xf6   :  { %v157_v5 = vpop.f32.mrf.mxu0  ;;  %2423 = vmatpush3.msra.mxu0 %v2421_v4 }
  0xf7   :  { %2424 = vmatprep.subr.mxu0 %v157_v5 }
  0xf8   :  { %2425 = vmatpush3.msra.mxu0 %v157_v5 }
  0xf9   :  { %2427 = vmatmul.mubr.msk.f32.vlgmr.msra.gmra.mxu0 %vm168_vm1, %v167_v6 }
  0xfa   :  { %2433 = vmatprep.mubr.msk.f32.mxu0 %vm256_vm2, %v296_v29 }
 0x1b9   :  { %v2428_v7 = vpop.f32.mrf.mxu0 }
 0x1ba   :  { %v251_v9 = vmax.f32 %v2428_v7, 0.0 }
 0x1bb   :  { %v241_v8 = vpop.f32.mrf.mxu0 }
 0x1bc   :  { %v250_v10 = vmax.f32 %v241_v8, 0.0  ;;  %v253_v12 = vadd.f32 %v2428_v7, %v251_v9 }
 0x1be   :  { %v252_v11 = vadd.f32 %v250_v10, %v241_v8  ;;  %v260_v14 = vsel %vm256_vm2, %v253_v12, 0.0 }
 0x1c0   :  { %v257_v13 = vsel %vm256_vm2, %v252_v11, 0.0 }
 0x1c1   :  { %258 = vadd.xlane.f32.xlu0 %v257_v13 }
 0x1c5   :  { %261 = vadd.xlane.f32.xlu0 %v260_v14 }
 0x1db   :  { %306 = vperm.xlu0 %2561, %v300_v31  }
 0x24a   :  { %v259_v15 = vpop.xlane.xlu0 %258 }
 0x24b   :  { %v264_v16 = vmul.f32 0.03125, %v259_v15 }
 0x24d   :  { %v266_v17 = vsub.f32 %v252_v11, %v264_v16 }
 0x24e   :  { %v262_v18 = vpop.xlane.xlu0 %261 }
 0x24f   :  { %v265_v19 = vmul.f32 0.03125, %v262_v18  ;;  %v268_v20 = vmul.f32 %v266_v17, %v266_v17 }
 0x251   :  { %v267_v21 = vsub.f32 %v253_v12, %v265_v19  ;;  %v270_v22 = vsel %vm256_vm2, %v268_v20, 0.0 }
 0x252   :  { %271 = vadd.xlane.f32.xlu1 %v270_v22 }
 0x253   :  { %v269_v23 = vmul.f32 %v267_v21, %v267_v21 }
 0x255   :  { %v273_v24 = vsel %vm256_vm2, %v269_v23, 0.0 }
 0x256   :  { %274 = vadd.xlane.f32.xlu1 %v273_v24  ;;  %v307_v61 = vpop.permute.xlu0 %306 }
 0x267   :  { %316 = vperm.xlu1 %2562, %v302_v30  }
 0x26b   :  { %311 = vperm.xlu1 %2562, %v301_v33  }
 0x26f   :  { %321 = vperm.xlu1 %2562, %v303_v34  }
 0x2db   :  { %v272_v35 = vpop.xlane.xlu1 %271 }
 0x2dc   :  { %v276_v36 = vmul.f32 0.03125, %v272_v35 }
 0x2de   :  { %v278_v37 = vadd.f32 1e-05, %v276_v36 }
 0x2df   :  { %v275_v38 = vpop.xlane.xlu1 %274 }
 0x2e0   :  { %2563 = vrsqrt.f32 %v278_v37  ;;  %v277_v39 = vmul.f32 0.03125, %v275_v38 }
 0x2e2   :  { %v279_v40 = vadd.f32 1e-05, %v277_v39 }
 0x2e3   :  { %v317_v59 = vpop.permute.xlu1 %316 }
 0x2e4   :  { %2565 = vrsqrt.f32 %v279_v40 }
 0x2e7   :  { %v312_v62 = vpop.permute.xlu1 %311 }
 0x2eb   :  { %v322_v5 = vpop.permute.xlu1 %321 }
 0x2ed   :  { %v2564_v41 = vpop.eup %2563 }
 0x2ee   :  { %v282_v43 = vmul.f32 %v2564_v41, %v266_v17 }
 0x2f0   :  { %v288_v45 = vmul.f32 %v2280_v42, %v282_v43 }
 0x2f1   :  { %v2566_v46 = vpop.eup %2565 }
 0x2f2   :  { %v283_v47 = vmul.f32 %v2566_v46, %v267_v21  ;;  %v294_v48 = vadd.f32 %v2281_v44, %v288_v45 }
 0x2f4   :  { %v289_v49 = vmul.f32 %v2280_v42, %v283_v47  ;;  %2447 = vmatprep.mubr.msk.f32.mxu1 %vm256_vm2, %v294_v48 }
 0x2f6   :  { %v295_v50 = vadd.f32 %v2281_v44, %v289_v49 }
 0x2f8   :  { %2429 = vmatprep.subr.msk.mxu0 %vm256_vm2, %v295_v50  ;;  %2448 = vmatmul.mubr.msk.f32.vlgmr.msra.gmra.mxu1 %vm256_vm2, %v295_v50 }
 0x2f9   :  { %2430 = vmatpush3.xpose.msk.msra.mxu0 %vm256_vm2, %v295_v50 }
 0x2fa   :  { %2431 = vmatprep.subr.msk.mxu0 %vm256_vm2, %v294_v48 }
 0x2fd   :  { %2432 = vmatpush3.xpose.msk.msra.mxu0 %vm256_vm2, %v294_v48 }
 0x300   :  { %2434 = vmatmul.mubr.msk.f32.vlgmr.msra.gmra.mxu0 %vm256_vm2, %v297_v51 }
 0x301   :  { %2436 = vmatprep.mubr.msk.f32.mxu0 %vm256_vm2, %v298_v52 }
 0x304   :  { %2437 = vmatmul.mubr.msk.f32.gmra.mxu0 %vm256_vm2, %v299_v53 }
 0x3b8   :  { %v2449_v55 = vpop.f32.mrf.mxu1 }
 0x3b9   :  { %v2854_v56 = vadd.f32 %v2449_v55, %v2288_v54 }
 0x3ba   :  { %v502_v57 = vpop.f32.mrf.mxu1 }
 0x3bb   :  { %v503_v58 = vadd.f32 %v2288_v54, %v502_v57 }
 0x3bd   :  { %512 = vrot.lane.b32.xlu1 %v503_v58, %s2718_s25  ;;  %2455 = vmatprep.subr.msk.mxu0 %vm521_vm3, %v503_v58  ;;  %v2880_v16 = vrot.slane %v503_v58, 4 }
 0x3be   :  { %2456 = vmatpush3.msk.msra.mxu0 %vm521_vm3, %v503_v58 }
 0x3c0   :  { %v2435_v60 = vpop.f32.mrf.mxu0 }
 0x3c1   :  { %v2859_v0 = vadd.f32 %v2435_v60, %v312_v62 }
 0x3c2   :  { %v408_v63 = vpop.f32.mrf.mxu0 }
 0x3c3   :  { %v2861_v1 = vadd.f32 %v408_v63, %v307_v61 }
 0x3c4   :  { %v2438_v2 = vpop.f32.mrf.mxu0 }
 0x3c5   :  { %2457 = vmatprep.mubr.msk.f32.mxu0 %vm514_vm4, %v2861_v1  ;;  %v2871_v7 = vadd.f32 %v2438_v2, %v322_v5 }
 0x3c6   :  { %v418_v3 = vpop.f32.mrf.mxu0  ;;  %2458 = vmatmul.mubr.msk.f32.vlgmr.msra.gmra.mxu0 %vm514_vm4, %v2859_v0 }
 0x3c7   :  { %v2867_v4 = vadd.f32 %v418_v3, %v317_v59 }
 0x3c9   :  { %2452 = vmatprep.mubr.msk.f32.mxu1 %vm514_vm4, %v2867_v4 }
 0x42f   :  { %v513_v6 = vpop.permute.xlu1 %512 }
 0x430   :  { %2450 = vmatprep.subr.msk.mxu1 %vm521_vm3, %v513_v6 }
 0x431   :  { %2451 = vmatpush3.msk.msra.mxu1 %vm521_vm3, %v513_v6 }
 0x432   :  { %2453 = vmatmul.mubr.msk.f32.vlgmr.msra.gmra.mxu1 %vm514_vm4, %v2871_v7 }
 0x486   :  { %v2459_v8 = vpop.f32.mrf.mxu0 }
 0x488   :  { %v673_v11 = vpop.f32.mrf.mxu0 }
 0x4f2   :  { %v2454_v9 = vpop.f32.mrf.mxu1 }
 0x4f3   :  { %v679_v10 = vadd.f32 %v2459_v8, %v2454_v9 }
 0x4f4   :  { %v590_v12 = vpop.f32.mrf.mxu1 }
 0x4f5   :  { %v674_v13 = vadd.f32 %v673_v11, %v590_v12  ;;  %v685_v14 = vsel %vm168_vm1, %v679_v10, -inf }
 0x4f6   :  { %686 = vmax.xlane.f32.xlu0 %v685_v14 }
 0x4f7   :  { %v682_v15 = vsel %vm168_vm1, %v674_v13, -inf }
 0x4f8   :  { %683 = vmax.xlane.f32.xlu1 %v682_v15 }
 0x509   :  { %710 = vrot.lane.b32.xlu1 %v503_v58, %s2719_s3 }
 0x50c   :  { %795 = vrot.lane.b32.xlu0 %v503_v58, %s2720_s26 }
 0x50d   :  { %919 = vrot.lane.b32.xlu1 %v2880_v16, %s2718_s25 }
 0x510   :  { %1002 = vrot.lane.b32.xlu0 %v2861_v1, %s2721_s27 }
 0x514   :  { %1004 = vrot.lane.b32.xlu0 %v2859_v0, %s2721_s27 }
 0x57f   :  { %v687_v17 = vpop.xlane.xlu0 %686 }
 0x580   :  { %v689_v18 = vsub.f32 %v679_v10, %v687_v17 }
 0x581   :  { %v684_v19 = vpop.xlane.xlu1 %683 }
 0x582   :  { %v692_v20 = vmul.f32 1.442695, %v689_v18  ;;  %v688_v21 = vsub.f32 %v674_v13, %v684_v19 }
 0x583   :  { %v796_v22 = vpop.permute.xlu0 %795 }
 0x584   :  { %2567 = vpow2.f32 %v692_v20  ;;  %v690_v23 = vmul.f32 1.442695, %v688_v21  ;;  %2465 = vmatprep.subr.msk.mxu0 %vm168_vm1, %v796_v22 }
 0x585   :  { %2466 = vmatpush3.xpose.msk.msra.mxu0 %vm168_vm1, %v796_v22  ;;  %v711_v24 = vpop.permute.xlu1 %710 }
 0x586   :  { %2569 = vpow2.f32 %v690_v23  ;;  %2460 = vmatprep.subr.msk.mxu1 %vm168_vm1, %v711_v24  ;;  %2475 = vmatprep.subr.msk.mxu0 %vm521_vm3, %v2880_v16 }
 0x587   :  { %2461 = vmatpush3.xpose.msk.msra.mxu1 %vm168_vm1, %v711_v24  ;;  %v1003_v40 = vpop.permute.xlu0 %1002 }
 0x589   :  { %v920_v25 = vpop.permute.xlu1 %919 }
 0x58a   :  { %2470 = vmatprep.subr.msk.mxu1 %vm521_vm3, %v920_v25 }
 0x58b   :  { %v1005_v44 = vpop.permute.xlu0 %1004 }
 0x591   :  { %v2568_v26 = vpop.eup %2567 }
 0x592   :  { %v697_v27 = vsel %vm168_vm1, %v2568_v26, 0.0 }
 0x593   :  { %v2570_v28 = vpop.eup %2569  ;;  %698 = vadd.xlane.f32.xlu1 %v697_v27 }
 0x594   :  { %v694_v29 = vsel %vm168_vm1, %v2570_v28, 0.0 }
 0x597   :  { %695 = vadd.xlane.f32.xlu1 %v694_v29 }
 0x5a8   :  { %914 = vrot.lane.b32.xlu1 %v2867_v4, %s2721_s27 }
 0x5ac   :  { %916 = vrot.lane.b32.xlu1 %v2871_v7, %s2721_s27 }
 0x61c   :  { %v699_v30 = vpop.xlane.xlu1 %698 }
 0x61d   :  { %2571 = vrcp.f32 %v699_v30 }
 0x620   :  { %v696_v31 = vpop.xlane.xlu1 %695 }
 0x621   :  { %2573 = vrcp.f32 %v696_v31 }
 0x624   :  { %v915_v42 = vpop.permute.xlu1 %914 }
 0x628   :  { %v917_v45 = vpop.permute.xlu1 %916 }
 0x62a   :  { %v2572_v32 = vpop.eup %2571 }
 0x62b   :  { %v703_v33 = vmul.f32 %v2572_v32, %v699_v30 }
 0x62d   :  { %v705_v35 = vsub.f32 2.0, %v703_v33 }
 0x62e   :  { %v2574_v34 = vpop.eup %2573 }
 0x62f   :  { %v702_v36 = vmul.f32 %v2574_v34, %v696_v31  ;;  %v707_v38 = vmul.f32 %v2572_v32, %v705_v35 }
 0x631   :  { %v704_v37 = vsub.f32 2.0, %v702_v36  ;;  %v709_v43 = vmul.f32 %v2568_v26, %v707_v38 }
 0x633   :  { %v706_v39 = vmul.f32 %v2574_v34, %v704_v37 }
 0x635   :  { %v708_v41 = vmul.f32 %v2570_v28, %v706_v39 }
 0x637   :  { %2462 = vmatprep.mubr.msk.f32.mxu1 %vm168_vm1, %v708_v41  ;;  %2467 = vmatprep.mubr.msk.f32.mxu0 %vm168_vm1, %v708_v41 }
 0x638   :  { %2463 = vmatmul.mubr.msk.f32.vlgmr.msra.gmra.mxu1 %vm168_vm1, %v709_v43  ;;  %2468 = vmatmul.mubr.msk.f32.vlgmr.msra.gmra.mxu0 %vm168_vm1, %v709_v43 }
 0x639   :  { %2471 = vmatpush3.msk.msra.mxu1 %vm521_vm3, %v920_v25  ;;  %2476 = vmatpush3.msk.msra.mxu0 %vm521_vm3, %v2880_v16 }
 0x63a   :  { %2472 = vmatprep.mubr.msk.f32.mxu1 %vm514_vm4, %v915_v42  ;;  %2477 = vmatprep.mubr.msk.f32.mxu0 %vm514_vm4, %v1003_v40  ;;  %v2962_v40 = vrot.slane %v2854_v56, 4 }
 0x63c   :  { %2473 = vmatmul.mubr.msk.f32.vlgmr.msra.gmra.mxu1 %vm514_vm4, %v917_v45  ;;  %2478 = vmatmul.mubr.msk.f32.vlgmr.msra.gmra.mxu0 %vm514_vm4, %v1005_v44 }
 0x6f8   :  { %v2909_v46 = vpop.f32.mrf.mxu1  ;;  %v2911_v47 = vpop.f32.mrf.mxu0 }
 0x6fa   :  { %v2913_v48 = vpop.f32.mrf.mxu1  ;;  %v2915_v49 = vpop.f32.mrf.mxu0 }
 0x6fc   :  { %v2474_v50 = vpop.f32.mrf.mxu1  ;;  %v2479_v51 = vpop.f32.mrf.mxu0 }
 0x6fd   :  { %v1084_v52 = vadd.f32 %v2479_v51, %v2474_v50 }
 0x6fe   :  { %v993_v53 = vpop.f32.mrf.mxu1  ;;  %v1078_v54 = vpop.f32.mrf.mxu0 }
 0x6ff   :  { %v1079_v55 = vadd.f32 %v1078_v54, %v993_v53  ;;  %v1090_v57 = vsel %vm168_vm1, %v1084_v52, -inf }
 0x700   :  { %1091 = vmax.xlane.f32.xlu0 %v1090_v57 }
 0x701   :  { %v1087_v58 = vsel %vm168_vm1, %v1079_v55, -inf }
 0x702   :  { %1088 = vmax.xlane.f32.xlu1 %v1087_v58 }
 0x789   :  { %v1092_v59 = vpop.xlane.xlu0 %1091 }
 0x78a   :  { %v1094_v60 = vsub.f32 %v1084_v52, %v1092_v59 }
 0x78b   :  { %v1089_v61 = vpop.xlane.xlu1 %1088 }
 0x78c   :  { %v1097_v62 = vmul.f32 1.442695, %v1094_v60  ;;  %v1093_v63 = vsub.f32 %v1079_v55, %v1089_v61 }
 0x78e   :  { %2575 = vpow2.f32 %v1097_v62  ;;  %v1095_v2 = vmul.f32 1.442695, %v1093_v63 }
 0x790   :  { %2577 = vpow2.f32 %v1095_v2 }
 0x79b   :  { %v2576_v3 = vpop.eup %2575 }
 0x79c   :  { %v1102_v5 = vsel %vm168_vm1, %v2576_v3, 0.0 }
 0x79d   :  { %v2578_v6 = vpop.eup %2577  ;;  %1103 = vadd.xlane.f32.xlu1 %v1102_v5 }
 0x79e   :  { %v1099_v8 = vsel %vm168_vm1, %v2578_v6, 0.0 }
 0x79f   :  { %1100 = vadd.xlane.f32.xlu0 %v1099_v8 }
 0x7ae   :  { %1200 = vrot.lane.b32.xlu1 %v2880_v16, %s2720_s26 }
 0x7b2   :  { %1320 = vrot.lane.b32.xlu1 %v2854_v56, %s2718_s25 }
 0x7b5   :  { %1115 = vrot.lane.b32.xlu0 %v2880_v16, %s2719_s3 }
 0x7b6   :  { %1403 = vrot.lane.b32.xlu1 %v2861_v1, %s2722_s1 }
 0x7b9   :  { %1315 = vrot.lane.b32.xlu0 %v2867_v4, %s2722_s1 }
 0x7ba   :  { %1405 = vrot.lane.b32.xlu1 %v2859_v0, %s2722_s1 }
 0x7bd   :  { %1317 = vrot.lane.b32.xlu0 %v2871_v7, %s2722_s1 }
 0x826   :  { %v1104_v9 = vpop.xlane.xlu1 %1103 }
 0x827   :  { %2579 = vrcp.f32 %v1104_v9 }
 0x828   :  { %v1101_v10 = vpop.xlane.xlu0 %1100 }
 0x829   :  { %2581 = vrcp.f32 %v1101_v10 }
 0x82a   :  { %v1201_v11 = vpop.permute.xlu1 %1200 }
 0x82b   :  { %2485 = vmatprep.subr.msk.mxu0 %vm168_vm1, %v1201_v11 }
 0x82c   :  { %v1116_v12 = vpop.permute.xlu0 %1115  ;;  %2486 = vmatpush3.xpose.msk.msra.mxu0 %vm168_vm1, %v1201_v11 }
 0x82d   :  { %2480 = vmatprep.subr.msk.mxu1 %vm168_vm1, %v1116_v12  ;;  %2495 = vmatprep.subr.msk.mxu0 %vm521_vm3, %v2854_v56 }
 0x82e   :  { %2481 = vmatpush3.xpose.msk.msra.mxu1 %vm168_vm1, %v1116_v12  ;;  %v1321_v13 = vpop.permute.xlu1 %1320 }
 0x82f   :  { %2490 = vmatprep.subr.msk.mxu1 %vm521_vm3, %v1321_v13 }
 0x830   :  { %v1316_v23 = vpop.permute.xlu0 %1315 }
 0x832   :  { %v1404_v24 = vpop.permute.xlu1 %1403 }
 0x834   :  { %v2580_v14 = vpop.eup %2579  ;;  %v1318_v26 = vpop.permute.xlu0 %1317 }
 0x835   :  { %v1108_v15 = vmul.f32 %v2580_v14, %v1104_v9 }
 0x836   :  { %v2582_v16 = vpop.eup %2581  ;;  %v1406_v27 = vpop.permute.xlu1 %1405 }
 0x837   :  { %v1110_v17 = vsub.f32 2.0, %v1108_v15  ;;  %v1107_v18 = vmul.f32 %v2582_v16, %v1101_v10 }
 0x839   :  { %v1109_v19 = vsub.f32 2.0, %v1107_v18  ;;  %v1112_v20 = vmul.f32 %v2580_v14, %v1110_v17 }
 0x83b   :  { %v1111_v21 = vmul.f32 %v2582_v16, %v1109_v19  ;;  %v1114_v25 = vmul.f32 %v2576_v3, %v1112_v20 }
 0x83d   :  { %v1113_v22 = vmul.f32 %v2578_v6, %v1111_v21 }
 0x83f   :  { %2482 = vmatprep.mubr.msk.f32.mxu1 %vm168_vm1, %v1113_v22  ;;  %2487 = vmatprep.mubr.msk.f32.mxu0 %vm168_vm1, %v1113_v22 }
 0x840   :  { %2483 = vmatmul.mubr.msk.f32.vlgmr.msra.gmra.mxu1 %vm168_vm1, %v1114_v25  ;;  %2488 = vmatmul.mubr.msk.f32.vlgmr.msra.gmra.mxu0 %vm168_vm1, %v1114_v25 }
 0x841   :  { %2491 = vmatpush3.msk.msra.mxu1 %vm521_vm3, %v1321_v13  ;;  %2496 = vmatpush3.msk.msra.mxu0 %vm521_vm3, %v2854_v56 }
 0x842   :  { %2492 = vmatprep.mubr.msk.f32.mxu1 %vm514_vm4, %v1316_v23  ;;  %2497 = vmatprep.mubr.msk.f32.mxu0 %vm514_vm4, %v1404_v24 }
 0x844   :  { %2493 = vmatmul.mubr.msk.f32.vlgmr.msra.gmra.mxu1 %vm514_vm4, %v1318_v26  ;;  %2498 = vmatmul.mubr.msk.f32.vlgmr.msra.gmra.mxu0 %vm514_vm4, %v1406_v27 }
 0x900   :  { %v2949_v28 = vpop.f32.mrf.mxu1  ;;  %v2951_v29 = vpop.f32.mrf.mxu0 }
 0x902   :  { %v2953_v30 = vpop.f32.mrf.mxu1  ;;  %v2955_v31 = vpop.f32.mrf.mxu0 }
 0x904   :  { %v2494_v32 = vpop.f32.mrf.mxu1  ;;  %v2499_v33 = vpop.f32.mrf.mxu0 }
 0x905   :  { %v1485_v34 = vadd.f32 %v2499_v33, %v2494_v32 }
 0x906   :  { %v1394_v35 = vpop.f32.mrf.mxu1  ;;  %v1479_v36 = vpop.f32.mrf.mxu0 }
 0x907   :  { %v1480_v37 = vadd.f32 %v1479_v36, %v1394_v35  ;;  %v1491_v38 = vsel %vm168_vm1, %v1485_v34, -inf  ;;  %v1280_v36 = vrot.slane %v2953_v30, 4 }
 0x908   :  { %1492 = vmax.xlane.f32.xlu1 %v1491_v38  ;;  %v875_v38 = vrot.slane %v2913_v48, 4 }
 0x909   :  { %v1488_v39 = vsel %vm168_vm1, %v1480_v37, -inf }
 0x90a   :  { %1489 = vmax.xlane.f32.xlu0 %v1488_v39 }
 0x919   :  { %1516 = vrot.lane.b32.xlu1 %v2854_v56, %s2719_s3 }
 0x91d   :  { %1721 = vrot.lane.b32.xlu1 %v2962_v40, %s2718_s25 }
 0x921   :  { %1716 = vrot.lane.b32.xlu1 %v2867_v4, %s2723_s7 }
 0x925   :  { %1718 = vrot.lane.b32.xlu1 %v2871_v7, %s2723_s7 }
 0x991   :  { %v1493_v41 = vpop.xlane.xlu1 %1492 }
 0x992   :  { %v1495_v42 = vsub.f32 %v1485_v34, %v1493_v41  ;;  %v883_v41 = vrot.slane %v2909_v46, 4 }
 0x993   :  { %v1490_v43 = vpop.xlane.xlu0 %1489 }
 0x994   :  { %v1498_v44 = vmul.f32 1.442695, %v1495_v42  ;;  %v1494_v45 = vsub.f32 %v1480_v37, %v1490_v43  ;;  %v1288_v37 = vrot.slane %v2949_v28, 4  ;;  %v891_v42 = vrot.slane %v2915_v49, 4 }
 0x995   :  { %v1517_v50 = vpop.permute.xlu1 %1516 }
 0x996   :  { %2583 = vpow2.f32 %v1498_v44  ;;  %v1496_v51 = vmul.f32 1.442695, %v1494_v45  ;;  %2500 = vmatprep.subr.msk.mxu1 %vm168_vm1, %v1517_v50 }
 0x997   :  { %2501 = vmatpush3.xpose.msk.msra.mxu1 %vm168_vm1, %v1517_v50 }
 0x998   :  { %2585 = vpow2.f32 %v1496_v51 }
 0x999   :  { %v1722_v52 = vpop.permute.xlu1 %1721 }
 0x99a   :  { %2510 = vmatprep.subr.msk.mxu1 %vm521_vm3, %v1722_v52 }
 0x99d   :  { %v1717_v2 = vpop.permute.xlu1 %1716 }
 0x9a1   :  { %v1719_v8 = vpop.permute.xlu1 %1718 }
 0x9a3   :  { %v2584_v53 = vpop.eup %2583 }
 0x9a4   :  { %v1503_v4 = vsel %vm168_vm1, %v2584_v53, 0.0 }
 0x9a5   :  { %v2586_v7 = vpop.eup %2585  ;;  %1504 = vadd.xlane.f32.xlu0 %v1503_v4 }
 0x9a6   :  { %v1500_v54 = vsel %vm168_vm1, %v2586_v7, 0.0 }
 0x9a9   :  { %1501 = vadd.xlane.f32.xlu0 %v1500_v54 }
 0x9bf   :  { %1601 = vrot.lane.b32.xlu0 %v2854_v56, %s2720_s26 }
 0x9c3   :  { %1804 = vrot.lane.b32.xlu0 %v2861_v1, %s2723_s7 }
 0x9c7   :  { %1806 = vrot.lane.b32.xlu0 %v2859_v0, %s2723_s7 }
 0xa2e   :  { %v1505_v55 = vpop.xlane.xlu0 %1504 }
 0xa2f   :  { %2587 = vrcp.f32 %v1505_v55 }
 0xa32   :  { %v1502_v57 = vpop.xlane.xlu0 %1501 }
 0xa33   :  { %2589 = vrcp.f32 %v1502_v57 }
 0xa36   :  { %v1602_v58 = vpop.permute.xlu0 %1601 }
 0xa37   :  { %2505 = vmatprep.subr.msk.mxu0 %vm168_vm1, %v1602_v58 }
 0xa38   :  { %2506 = vmatpush3.xpose.msk.msra.mxu0 %vm168_vm1, %v1602_v58 }
 0xa39   :  { %2515 = vmatprep.subr.msk.mxu0 %vm521_vm3, %v2962_v40 }
 0xa3a   :  { %v1805_v5 = vpop.permute.xlu0 %1804 }
 0xa3c   :  { %v2588_v59 = vpop.eup %2587 }
 0xa3d   :  { %v1509_v60 = vmul.f32 %v2588_v59, %v1505_v55 }
 0xa3e   :  { %v1807_v9 = vpop.permute.xlu0 %1806 }
 0xa3f   :  { %v1511_v56 = vsub.f32 2.0, %v1509_v60 }
 0xa40   :  { %v2590_v61 = vpop.eup %2589 }
 0xa41   :  { %v1508_v62 = vmul.f32 %v2590_v61, %v1502_v57  ;;  %v1513_v63 = vmul.f32 %v2588_v59, %v1511_v56  ;;  %v2128_v56 = vld [vmem:[#allocation7 + $0x18] sm:$0xff] }
 0xa43   :  { %v1510_v1 = vsub.f32 2.0, %v1508_v62  ;;  %v1515_v6 = vmul.f32 %v2584_v53, %v1513_v63  ;;  %v2127_v63 = vld [vmem:[#allocation7 + $0x10] sm:$0xff] }
 0xa45   :  { %v1512_v0 = vmul.f32 %v2590_v61, %v1510_v1 }
 0xa47   :  { %v1514_v3 = vmul.f32 %v2586_v7, %v1512_v0  ;;  %v2126_v0 = vld [vmem:[#allocation7 + $0x8] sm:$0xff] }
 0xa49   :  { %2502 = vmatprep.mubr.msk.f32.mxu1 %vm168_vm1, %v1514_v3  ;;  %2507 = vmatprep.mubr.msk.f32.mxu0 %vm168_vm1, %v1514_v3  ;;  %v2125_v3 = vld [vmem:[#allocation7] sm:$0xff] }
 0xa4a   :  { %2503 = vmatmul.mubr.msk.f32.vlgmr.msra.gmra.mxu1 %vm168_vm1, %v1515_v6  ;;  %2508 = vmatmul.mubr.msk.f32.vlgmr.msra.gmra.mxu0 %vm168_vm1, %v1515_v6 }
 0xa4b   :  { %2511 = vmatpush3.msk.msra.mxu1 %vm521_vm3, %v1722_v52  ;;  %2516 = vmatpush3.msk.msra.mxu0 %vm521_vm3, %v2962_v40 }
 0xa4c   :  { %2512 = vmatprep.mubr.msk.f32.mxu1 %vm514_vm4, %v1717_v2  ;;  %2517 = vmatprep.mubr.msk.f32.mxu0 %vm514_vm4, %v1805_v5  ;;  %v899_v5 = vrot.slane %v2911_v47, 4 }
 0xa4e   :  { %2513 = vmatmul.mubr.msk.f32.vlgmr.msra.gmra.mxu1 %vm514_vm4, %v1719_v8  ;;  %2518 = vmatmul.mubr.msk.f32.vlgmr.msra.gmra.mxu0 %vm514_vm4, %v1807_v9 }
 0xb0a   :  { %v2504_v10 = vpop.f32.mrf.mxu1  ;;  %v2992_v11 = vpop.f32.mrf.mxu0 }
 0xb0b   :  { %v1705_v8 = vrot.slane %v2992_v11, 4 }
 0xb0c   :  { %v2994_v12 = vpop.f32.mrf.mxu1  ;;  %v1671_v13 = vpop.f32.mrf.mxu0 }
 0xb0d   :  { %v1681_v39 = vrot.slane %v2994_v12, 4 }
 0xb0e   :  { %v2514_v14 = vpop.f32.mrf.mxu1  ;;  %v2519_v15 = vpop.f32.mrf.mxu0 }
 0xb0f   :  { %v1886_v16 = vadd.f32 %v2519_v15, %v2514_v14 }
 0xb10   :  { %v1795_v17 = vpop.f32.mrf.mxu1  ;;  %v1880_v18 = vpop.f32.mrf.mxu0 }
 0xb11   :  { %v1881_v19 = vadd.f32 %v1880_v18, %v1795_v17  ;;  %v1892_v20 = vsel %vm168_vm1, %v1886_v16, -inf }
 0xb12   :  { %1893 = vmax.xlane.f32.xlu0 %v1892_v20 }
 0xb13   :  { %v1889_v21 = vsel %vm168_vm1, %v1881_v19, -inf }
 0xb14   :  { %1890 = vmax.xlane.f32.xlu1 %v1889_v21 }
 0xb9b   :  { %v1894_v22 = vpop.xlane.xlu0 %1893 }
 0xb9c   :  { %v1896_v23 = vsub.f32 %v1886_v16, %v1894_v22 }
 0xb9d   :  { %v1891_v24 = vpop.xlane.xlu1 %1890 }
 0xb9e   :  { %v1899_v25 = vmul.f32 1.442695, %v1896_v23  ;;  %v1895_v26 = vsub.f32 %v1881_v19, %v1891_v24 }
 0xba0   :  { %2591 = vpow2.f32 %v1899_v25  ;;  %v1897_v27 = vmul.f32 1.442695, %v1895_v26 }
 0xba2   :  { %2593 = vpow2.f32 %v1897_v27 }
 0xbad   :  { %v2592_v32 = vpop.eup %2591 }
 0xbae   :  { %v1904_v33 = vsel %vm168_vm1, %v2592_v32, 0.0 }
 0xbaf   :  { %v2594_v34 = vpop.eup %2593  ;;  %1905 = vadd.xlane.f32.xlu1 %v1904_v33 }
 0xbb0   :  { %v1901_v35 = vsel %vm168_vm1, %v2594_v34, 0.0 }
 0xbb1   :  { %1902 = vadd.xlane.f32.xlu0 %v1901_v35 }
 0xbc0   :  { %2002 = vrot.lane.b32.xlu1 %v2962_v40, %s2720_s26 }
 0xbc4   :  { %1281 = vrot.lane.b32.xlu1 %v1280_v36, %s2724_s28 }
 0xbc7   :  { %1917 = vrot.lane.b32.xlu0 %v2962_v40, %s2719_s3  ;;  %v1689_v40 = vrot.slane %v2504_v10, 4 }
 0xbc8   :  { %1289 = vrot.lane.b32.xlu1 %v1288_v37, %s2725_s29 }
 0xbcb   :  { %1285 = vrot.lane.b32.xlu0 %v2949_v28, %s2714_s14  ;;  %v1296_v28 = vrot.slane %v2955_v31, 4 }
 0xbcc   :  { %880 = vrot.lane.b32.xlu1 %v2909_v46, %s2714_s14  ;;  %v1304_v46 = vrot.slane %v2951_v29, 4 }
 0xbcf   :  { %876 = vrot.lane.b32.xlu0 %v875_v38, %s2724_s28 }
 0xbd0   :  { %1682 = vrot.lane.b32.xlu1 %v1681_v39, %s2724_s28 }
 0xbd3   :  { %1293 = vrot.lane.b32.xlu0 %v2955_v31, %s2726_s30  ;;  %v1697_v31 = vrot.slane %v1671_v13, 4 }
 0xbd4   :  { %884 = vrot.lane.b32.xlu1 %v883_v41, %s2725_s29 }
 0xbd7   :  { %1297 = vrot.lane.b32.xlu0 %v1296_v28, %s2727_s9 }
 0xbd8   :  { %1686 = vrot.lane.b32.xlu1 %v2504_v10, %s2714_s14 }
 0xbdb   :  { %1301 = vrot.lane.b32.xlu0 %v2951_v29, %s2728_s10 }
 0xbdc   :  { %888 = vrot.lane.b32.xlu1 %v2915_v49, %s2726_s30 }
 0xbdf   :  { %1305 = vrot.lane.b32.xlu0 %v1304_v46, %s2729_s11 }
 0xbe0   :  { %1690 = vrot.lane.b32.xlu1 %v1689_v40, %s2725_s29 }
 0xbe3   :  { %1698 = vrot.lane.b32.xlu0 %v1697_v31, %s2727_s9 }
 0xbe4   :  { %892 = vrot.lane.b32.xlu1 %v891_v42, %s2727_s9 }
 0xbe8   :  { %1694 = vrot.lane.b32.xlu1 %v1671_v13, %s2726_s30 }
 0xbec   :  { %896 = vrot.lane.b32.xlu1 %v2911_v47, %s2728_s10 }
 0xc38   :  { %v1906_v43 = vpop.xlane.xlu1 %1905 }
 0xc39   :  { %2595 = vrcp.f32 %v1906_v43 }
 0xc3a   :  { %v1903_v29 = vpop.xlane.xlu0 %1902 }
 0xc3b   :  { %2597 = vrcp.f32 %v1903_v29 }
 0xc3c   :  { %v2003_v44 = vpop.permute.xlu1 %2002 }
 0xc3d   :  { %2525 = vmatprep.subr.msk.mxu0 %vm168_vm1, %v2003_v44 }
 0xc3e   :  { %v1918_v45 = vpop.permute.xlu0 %1917  ;;  %2526 = vmatpush3.xpose.msk.msra.mxu0 %vm168_vm1, %v2003_v44 }
 0xc3f   :  { %2520 = vmatprep.subr.msk.mxu1 %vm168_vm1, %v1918_v45 }
 0xc40   :  { %2521 = vmatpush3.xpose.msk.msra.mxu1 %vm168_vm1, %v1918_v45  ;;  %v1282_v9 = vpop.permute.xlu1 %1281 }
 0xc41   :  { %2530 = vmatprep.subr.mxu1 %v2128_v56  ;;  %v1308_v27 = vsel %vm514_vm4, %v2953_v30, %v1282_v9 }
 0xc42   :  { %v1286_v14 = vpop.permute.xlu0 %1285 }
 0xc44   :  { %v1290_v10 = vpop.permute.xlu1 %1289 }
 0xc46   :  { %v2596_v49 = vpop.eup %2595  ;;  %v877_v16 = vpop.permute.xlu0 %876 }
 0xc47   :  { %v1910_v50 = vmul.f32 %v2596_v49, %v1906_v43  ;;  %v903_v37 = vsel %vm514_vm4, %v2913_v48, %v877_v16 }
 0xc48   :  { %v2598_v51 = vpop.eup %2597  ;;  %v881_v13 = vpop.permute.xlu1 %880 }
 0xc49   :  { %v1912_v52 = vsub.f32 2.0, %v1910_v50  ;;  %v1909_v53 = vmul.f32 %v2598_v51, %v1903_v29  ;;  %v904_v30 = vsel %vm84_vm0, %v903_v37, %v881_v13 }
 0xc4a   :  { %v1294_v18 = vpop.permute.xlu0 %1293 }
 0xc4b   :  { %v1911_v4 = vsub.f32 2.0, %v1909_v53  ;;  %v1914_v7 = vmul.f32 %v2596_v49, %v1912_v52 }
 0xc4c   :  { %v1683_v15 = vpop.permute.xlu1 %1682 }
 0xc4d   :  { %v1913_v54 = vmul.f32 %v2598_v51, %v1911_v4  ;;  %v1916_v57 = vmul.f32 %v2592_v32, %v1914_v7  ;;  %v1709_v50 = vsel %vm514_vm4, %v2994_v12, %v1683_v15 }
 0xc4e   :  { %v1298_v19 = vpop.permute.xlu0 %1297 }
 0xc4f   :  { %v1915_v55 = vmul.f32 %v2594_v34, %v1913_v54  ;;  %v1309_v34 = vsel %vm84_vm0, %v1308_v27, %v1286_v14 }
 0xc50   :  { %v885_v17 = vpop.permute.xlu1 %884  ;;  %v1310_v36 = vsel %vm905_vm5, %v1309_v34, %v1290_v10 }
 0xc51   :  { %2522 = vmatprep.mubr.msk.f32.mxu1 %vm168_vm1, %v1915_v55  ;;  %2527 = vmatprep.mubr.msk.f32.mxu0 %vm168_vm1, %v1915_v55  ;;  %v1311_v39 = vsel %vm168_vm1, %v1310_v36, %v1294_v18  ;;  %v906_v40 = vsel %vm905_vm5, %v904_v30, %v885_v17  ;;  %v2343_v36 = vld [vmem:[#allocation8 + $0x5] ss:$0 sm:$0xff] }
 0xc52   :  { %2523 = vmatmul.mubr.msk.f32.vlgmr.msra.gmra.mxu1 %vm168_vm1, %v1916_v57  ;;  %2528 = vmatmul.mubr.msk.f32.vlgmr.msra.gmra.mxu0 %vm168_vm1, %v1916_v57  ;;  %v1302_v21 = vpop.permute.xlu0 %1301  ;;  %v1312_v41 = vsel %vm908_vm6, %v1311_v39, %v1298_v19 }
 0xc53   :  { %2531 = vmatpush3.msra.mxu1 %v2128_v56  ;;  %v1313_v28 = vsel %vm910_vm7, %v1312_v41, %v1302_v21 }
 0xc54   :  { %2532 = vmatprep.subr.mxu1 %v2127_v63  ;;  %v1687_v47 = vpop.permute.xlu1 %1686 }
 0xc55   :  { %2533 = vmatpush3.msra.mxu1 %v2127_v63  ;;  %v1710_v52 = vsel %vm84_vm0, %v1709_v50, %v1687_v47 }
 0xc56   :  { %2534 = vmatprep.subr.mxu1 %v2126_v0  ;;  %v1306_v23 = vpop.permute.xlu0 %1305 }
 0xc57   :  { %2535 = vmatpush3.msra.mxu1 %v2126_v0  ;;  %v1314_v31 = vsel %vm912_vm8, %v1313_v28, %v1306_v23 }
 0xc58   :  { %2536 = vmatprep.subr.mxu1 %v2125_v3  ;;  %v889_v20 = vpop.permute.xlu1 %888  ;;  %v2118_v44 = vrot.slane %v1314_v31, 4 }
 0xc59   :  { %2537 = vmatpush3.msra.mxu1 %v2125_v3  ;;  %v907_v42 = vsel %vm168_vm1, %v906_v40, %v889_v20  ;;  %v2339_v3 = vld [vmem:[#allocation8 + $0x3] ss:$0 sm:$0xff] }
 0xc5a   :  { %v1699_v25 = vpop.permute.xlu0 %1698 }
 0xc5c   :  { %v1691_v22 = vpop.permute.xlu1 %1690 }
 0xc5d   :  { %v1711_v7 = vsel %vm905_vm5, %v1710_v52, %v1691_v22 }
 0xc60   :  { %v893_v24 = vpop.permute.xlu1 %892 }
 0xc61   :  { %v909_v48 = vsel %vm908_vm6, %v907_v42, %v893_v24 }
 0xc64   :  { %v1695_v26 = vpop.permute.xlu1 %1694 }
 0xc65   :  { %v1712_v55 = vsel %vm168_vm1, %v1711_v7, %v1695_v26 }
 0xc68   :  { %v897_v33 = vpop.permute.xlu1 %896 }
 0xc69   :  { %v911_v45 = vsel %vm910_vm7, %v909_v48, %v897_v33  ;;  %v2342_v33 = vld [vmem:[#allocation8 + $0x4] ss:$0 sm:$0xff] }
 0xd12   :  { %v2524_v58 = vpop.f32.mrf.mxu1  ;;  %v2529_v61 = vpop.f32.mrf.mxu0 }
 0xd13   :  { %2087 = vrot.lane.b32.xlu0 %v2524_v58, %s2714_s14  ;;  %v2090_v62 = vrot.slane %v2524_v58, 4  ;;  %v2106_v1 = vrot.slane %v2529_v61, 4 }
 0xd14   :  { %v3045_v59 = vpop.f32.mrf.mxu1  ;;  %v2072_v2 = vpop.f32.mrf.mxu0 }
 0xd15   :  { %v2082_v60 = vrot.slane %v3045_v59, 4  ;;  %v2098_v6 = vrot.slane %v2072_v2, 4 }
 0xd17   :  { %2083 = vrot.lane.b32.xlu1 %v2082_v60, %s2724_s28  ;;  %2103 = vrot.lane.b32.xlu0 %v2529_v61, %s2728_s10  ;;  %v1713_v61 = vsel %vm908_vm6, %v1712_v55, %v1699_v25 }
 0xd1b   :  { %2091 = vrot.lane.b32.xlu0 %v2090_v62, %s2725_s29  ;;  %2107 = vrot.lane.b32.xlu1 %v2106_v1, %s2729_s11 }
 0xd1f   :  { %1702 = vrot.lane.b32.xlu1 %v2992_v11, %s2728_s10  ;;  %2095 = vrot.lane.b32.xlu0 %v2072_v2, %s2726_s30 }
 0xd23   :  { %900 = vrot.lane.b32.xlu0 %v899_v5, %s2729_s11 }
 0xd27   :  { %2099 = vrot.lane.b32.xlu0 %v2098_v6, %s2727_s9 }
 0xd2b   :  { %1706 = vrot.lane.b32.xlu0 %v1705_v8, %s2729_s11 }
 0xd85   :  { %v2088_v11 = vpop.permute.xlu0 %2087 }
 0xd89   :  { %v2104_v32 = vpop.permute.xlu0 %2103  ;;  %v2084_v38 = vpop.permute.xlu1 %2083 }
 0xd8a   :  { %v2110_v43 = vsel %vm514_vm4, %v3045_v59, %v2084_v38 }
 0xd8b   :  { %v2111_v53 = vsel %vm84_vm0, %v2110_v43, %v2088_v11 }
 0xd8d   :  { %v2092_v35 = vpop.permute.xlu0 %2091  ;;  %v2108_v29 = vpop.permute.xlu1 %2107 }
 0xd8e   :  { %v2112_v54 = vsel %vm905_vm5, %v2111_v53, %v2092_v35 }
 0xd91   :  { %v2096_v46 = vpop.permute.xlu0 %2095  ;;  %v1703_v12 = vpop.permute.xlu1 %1702 }
 0xd92   :  { %v2113_v57 = vsel %vm168_vm1, %v2112_v54, %v2096_v46  ;;  %v1714_v62 = vsel %vm910_vm7, %v1713_v61, %v1703_v12 }
 0xd95   :  { %v901_v49 = vpop.permute.xlu0 %900 }
 0xd96   :  { %v913_v51 = vsel %vm912_vm8, %v911_v45, %v901_v49 }
 0xd97   :  { %v2123_v4 = vsel %vm521_vm3, %v913_v51, %v2118_v44 }
 0xd98   :  { %2538 = vmatprep.mubr.msk.f32.mxu1 %vm256_vm2, %v2123_v4 }
 0xd99   :  { %v2100_v58 = vpop.permute.xlu0 %2099 }
 0xd9a   :  { %v2114_v59 = vsel %vm908_vm6, %v2113_v57, %v2100_v58 }
 0xd9b   :  { %v2115_v60 = vsel %vm910_vm7, %v2114_v59, %v2104_v32 }
 0xd9c   :  { %v2116_v56 = vsel %vm912_vm8, %v2115_v60, %v2108_v29 }
 0xd9d   :  { %v2121_v1 = vrot.slane %v2116_v56, 4  ;;  %v1707_v63 = vpop.permute.xlu0 %1706 }
 0xd9e   :  { %v1715_v0 = vsel %vm912_vm8, %v1714_v62, %v1707_v63 }
 0xd9f   :  { %v2124_v2 = vsel %vm521_vm3, %v1715_v0, %v2121_v1 }
 0xda0   :  { %2539 = vmatmul.mubr.msk.f32.vlgmr.msra.gmra.mxu1 %vm256_vm2, %v2124_v2 }
 0xe60   :  { %v2540_v5 = vpop.f32.mrf.mxu1 }
 0xe61   :  { %v2212_v6 = vadd.f32 %v2540_v5, %v2339_v3 }
 0xe62   :  { %v2206_v8 = vpop.f32.mrf.mxu1 }
 0xe63   :  { %v2207_v9 = vadd.f32 %v2339_v3, %v2206_v8  ;;  %v2220_v10 = vsel %vm256_vm2, %v2212_v6, 0.0 }
 0xe64   :  { %2221 = vadd.xlane.f32.xlu0 %v2220_v10 }
 0xe65   :  { %v2217_v13 = vsel %vm256_vm2, %v2207_v9, 0.0 }
 0xe66   :  { %2218 = vadd.xlane.f32.xlu1 %v2217_v13 }
 0xeed   :  { %v2222_v14 = vpop.xlane.xlu0 %2221 }
 0xeee   :  { %v2224_v15 = vmul.f32 0.03125, %v2222_v14 }
 0xeef   :  { %v2219_v16 = vpop.xlane.xlu1 %2218 }
 0xef0   :  { %v2226_v17 = vsub.f32 %v2212_v6, %v2224_v15  ;;  %v2223_v18 = vmul.f32 0.03125, %v2219_v16 }
 0xef2   :  { %v2225_v47 = vsub.f32 %v2207_v9, %v2223_v18  ;;  %v2228_v19 = vmul.f32 %v2226_v17, %v2226_v17 }
 0xef4   :  { %v2232_v20 = vsel %vm256_vm2, %v2228_v19, 0.0  ;;  %v2227_v21 = vmul.f32 %v2225_v47, %v2225_v47 }
 0xef5   :  { %2233 = vadd.xlane.f32.xlu1 %v2232_v20 }
 0xef6   :  { %v2229_v22 = vsel %vm256_vm2, %v2227_v21, 0.0 }
 0xef7   :  { %2230 = vadd.xlane.f32.xlu0 %v2229_v22 }
 0xf7e   :  { %v2234_v23 = vpop.xlane.xlu1 %2233 }
 0xf7f   :  { %v2236_v24 = vmul.f32 0.03125, %v2234_v23 }
 0xf80   :  { %v2231_v25 = vpop.xlane.xlu0 %2230 }
 0xf81   :  { %v2238_v26 = vadd.f32 1e-05, %v2236_v24  ;;  %v2235_v11 = vmul.f32 0.03125, %v2231_v25 }
 0xf83   :  { %2599 = vrsqrt.f32 %v2238_v26  ;;  %v2237_v27 = vadd.f32 1e-05, %v2235_v11 }
 0xf85   :  { %2601 = vrsqrt.f32 %v2237_v27 }
 0xf90   :  { %v2600_v32 = vpop.eup %2599 }
 0xf91   :  { %v2242_v34 = vmul.f32 %v2600_v32, %v2226_v17 }
 0xf92   :  { %v2602_v35 = vpop.eup %2601 }
 0xf93   :  { %v2241_v37 = vmul.f32 %v2602_v35, %v2225_v47  ;;  %v2248_v38 = vmul.f32 %v2342_v33, %v2242_v34 }
 0xf95   :  { %v2247_v39 = vmul.f32 %v2342_v33, %v2241_v37  ;;  %v2254_v41 = vadd.f32 %v2343_v36, %v2248_v38 }
 0xf97   :  { %v2253_v30 = vadd.f32 %v2343_v36, %v2247_v39  ;;  %2256 = vst.msk [vmem:[#allocation10 + $0x8] sm:$0xff] %vm256_vm2, %v2254_v41 }
 0xf99   :  { %2255 = vst.msk [vmem:[#allocation10] sm:$0xff] %vm256_vm2, %v2253_v30 }
 0xf9a   :  { %2694 = shalt.err (!%p2691_p10)
}
 0xf9b   :  { %2268 = dma.vmem_to_hbm [thread:$0]  %s2263_s15, 256, %s3116_s8, [#allocation4], %s2713_s13, %s2713_s13, %s2714_s14  }
 0xf9c   :  { %2709 = dma.done.wait [#allocation4], 256  }
 0xf9d   :  { %2710 = vsyncadd [#allocation4], 4294967040 }
 0xf9e   :  { %2272 = vsyncpa [#allocation3], 1 }
 0xf9f   :  { %2273 = vsyncpa [#allocation6], 1 }
 0xfa0   :  { %2274 = vsyncpa [#allocation9], 1 }
 0xfa1   :  { %2275 = vsyncpa [#allocation4], 1 }

</bundles_post_ra>
